<compile_context>
chip_gen: v7x
topology: tpu7x:2x2x1
jax: 0.10.0
libtpu: 0.0.40
codegen_flags: <defaults>
</compile_context>

<pallas_src>
import functools

import jax
import jax.numpy as jnp
from jax.experimental import pallas as pl
from jax.experimental.pallas import tpu as pltpu


def _seq_atten_kernel(
    fc_ref, fs_ref,
    wq_ref, bq_ref, wk_ref, bk_ref, wv_ref, bv_ref,
    hms_ref, hme_ref, wo_ref, bo_ref,
    ln1_ref, w1_ref, b1_ref, ln2_ref, w2_ref, b2_ref,
    o_ref,
    *, num_heads):
    f32, bf16 = jnp.float32, jnp.bfloat16

    Bt, L, C = fs_ref.shape
    H = num_heads
    head_dim = C // H
    scaling = float(head_dim) ** (-0.5)

    x_c = fc_ref[...]                               # (Bt, C)   one query token per batch element
    x_s = fs_ref[...].reshape(Bt * L, C)            # (Bt*L, C) sequence tokens (L=8 -> layout no-op)

    # ---- in_proj: q / k / v (bf16 MXU operands, fp32 accumulation) ----
    q = jnp.dot(x_c.astype(bf16), wq_ref[...], preferred_element_type=f32) + bq_ref[...]
    q = q * scaling                                                              # (Bt, C)
    k = jnp.dot(x_s.astype(bf16), wk_ref[...], preferred_element_type=f32) + bk_ref[...]   # (Bt*L, C)
    v = jnp.dot(x_s.astype(bf16), wv_ref[...], preferred_element_type=f32) + bv_ref[...]   # (Bt*L, C)
    k3 = k.reshape(Bt, L, C)
    v3 = v.reshape(Bt, L, C)

    # ---- per-head scores: broadcast q over L (sublanes), elementwise * k,
    #      then sum within each head via the (C, H) head-sum mask on the MXU.
    qk = q[:, None, :] * k3                                                       # (Bt, L, C)
    scores = jnp.dot(qk.reshape(Bt * L, C).astype(bf16), hms_ref[...],
                     preferred_element_type=f32).reshape(Bt, L, H)                # (Bt, L, H)

    # ---- softmax over the L axis (per batch element, per head; all f32) ----
    m = jnp.max(scores, axis=1, keepdims=True)                                    # (Bt, 1, H)
    e = jnp.exp(scores - m)                                                       # (Bt, L, H)
    denom = jnp.sum(e, axis=1, keepdims=True)                                     # (Bt, 1, H)
    p = e * pl.reciprocal(denom, approx=True)                                     # (Bt, L, H)

    # ---- weighted value sum: expand head weights to head_dim lanes (MXU mask),
    #      multiply with v and reduce over L.
    p_full = jnp.dot(p.reshape(Bt * L, H).astype(bf16), hme_ref[...],
                     preferred_element_type=f32).reshape(Bt, L, C)                # (Bt, L, C)
    v_o = jnp.sum(p_full * v3, axis=1)                                            # (Bt, C)

    # ---- output projection ----
    v_o = jnp.dot(v_o.astype(bf16), wo_ref[...], preferred_element_type=f32) + bo_ref[...]  # (Bt, C)

    # ---- mlp_head: LayerNorm -> Dropout -> Linear(C,256) -> LayerNorm -> Linear(256,out) ----
    # TODO(synk): Dropout(p=0.2) implemented in eval mode (identity); training-mode stochastic drop not reproduced.
    def layer_norm(x, ln_ref):
        mu = jnp.mean(x, axis=-1, keepdims=True)
        var = jnp.mean((x - mu) ** 2, axis=-1, keepdims=True)
        return (x - mu) * jax.lax.rsqrt(var + 1e-5) * ln_ref[0:1, :] + ln_ref[1:2, :]

    h = layer_norm(v_o, ln1_ref)
    h = jnp.dot(h.astype(bf16), w1_ref[...], preferred_element_type=f32) + b1_ref[...]       # (Bt, 256)
    h = layer_norm(h, ln2_ref)
    out = jnp.dot(h.astype(bf16), w2_ref[...], preferred_element_type=f32) + b2_ref[...]     # (Bt, OUT_PAD)
    o_ref[...] = out   # lane-dense (OUT padded to a multiple of 128) full-tile store


def _full_spec(shape):
    nd = len(shape)
    return pl.BlockSpec(shape, lambda i, _nd=nd: (0,) * _nd)


def _round8(n):
    return ((n + 7) // 8) * 8


def pack_params(params, num_heads):
    """One-time weight packing (transposes, bf16 casts, output-lane padding).

    Hoisted out of the per-call path: call once per parameter set and reuse."""
    f32, bf16 = jnp.float32, jnp.bfloat16
    C = params["out_proj_w"].shape[0]
    hidden = params["w1"].shape[0]
    out_channels = params["w2"].shape[0]
    out_pad = max(128, ((out_channels + 127) // 128) * 128)
    head_dim = C // num_heads

    ipw, ipb = params["in_proj_weight"], params["in_proj_bias"]
    wq = ipw[0:C].T.astype(bf16)
    bq = ipb[0:C].reshape(1, C).astype(f32)
    wk = ipw[C:2 * C].T.astype(bf16)
    bk = ipb[C:2 * C].reshape(1, C).astype(f32)
    wv = ipw[2 * C:3 * C].T.astype(bf16)
    bv = ipb[2 * C:3 * C].reshape(1, C).astype(f32)

    # Head masks (exact 0/1 in bf16).
    hm = (jnp.arange(C)[:, None] // head_dim == jnp.arange(num_heads)[None, :])
    hm_sum = hm.astype(bf16)      # (C, H): sums head_dim lanes per head
    hm_exp = hm.T.astype(bf16)    # (H, C): expands one head weight to head_dim lanes

    wo = params["out_proj_w"].T.astype(bf16)
    bo = params["out_proj_b"].reshape(1, C).astype(f32)

    ln1 = jnp.stack([params["ln1_g"], params["ln1_b"]]).astype(f32)               # (2, C)
    w1 = params["w1"].T.astype(bf16)                                              # (C, hidden)
    b1 = params["b1"].reshape(1, hidden).astype(f32)
    ln2 = jnp.stack([params["ln2_g"], params["ln2_b"]]).astype(f32)               # (2, hidden)
    w2 = jnp.zeros((hidden, out_pad), f32).at[:, :out_channels].set(params["w2"].T).astype(bf16)
    b2 = jnp.zeros((1, out_pad), f32).at[:, :out_channels].set(params["b2"].reshape(1, -1))

    weights = (wq, bq, wk, bk, wv, bv, hm_sum, hm_exp, wo, bo,
               ln1, w1, b1, ln2, w2, b2)
    meta = dict(num_heads=num_heads, embed_channels=C, hidden=hidden,
                out_channels=out_channels, out_pad=out_pad)
    return weights, meta


def seq_atten_packed(fvec_c, fvec_seq, weights, meta, b_tile=None):
    """fvec_c: [B, 1, C], fvec_seq: [B, L, C] -> [B, 1, out_channels]."""
    B, _, C = fvec_c.shape
    L = fvec_seq.shape[1]
    out_channels = meta["out_channels"]
    out_pad = meta["out_pad"]
    num_heads = meta["num_heads"]

    # ---- batch tiling: big tiles (fills MXU rows, few grid steps); keep >= 2
    #      grid steps when B permits so both v7x TensorCores get work.
    if b_tile is None:
        b_tile = 256
        if B >= 16:
            b_tile = min(b_tile, _round8(pl.cdiv(B, 2)))
    b_tile = max(8, min(_round8(b_tile), _round8(B)))
    b_pad = pl.cdiv(B, b_tile) * b_tile

    fc = fvec_c.reshape(B, C)
    fs = fvec_seq
    if b_pad != B:
        fc = jnp.pad(fc, ((0, b_pad - B), (0, 0)))
        fs = jnp.pad(fs, ((0, b_pad - B), (0, 0), (0, 0)))

    grid = (b_pad // b_tile,)
    in_specs = [
        pl.BlockSpec((b_tile, C), lambda i: (i, 0)),
        pl.BlockSpec((b_tile, L, C), lambda i: (i, 0, 0)),
    ] + [_full_spec(w.shape) for w in weights]

    out = pl.pallas_call(
        functools.partial(_seq_atten_kernel, num_heads=num_heads),
        out_shape=jax.ShapeDtypeStruct((b_pad, out_pad), jnp.float32),
        grid=grid,
        in_specs=in_specs,
        out_specs=pl.BlockSpec((b_tile, out_pad), lambda i: (i, 0)),
        compiler_params=pltpu.CompilerParams(dimension_semantics=("parallel",)),
    )(fc, fs, *weights)

    return out[:B, :out_channels].reshape(B, 1, out_channels)


def seq_atten(fvec_c, fvec_seq, params, num_heads, b_tile=None):
    """Convenience wrapper: packs params on every call.  Prefer pack_params()
    once + seq_atten_packed() in a hot loop."""
    weights, meta = pack_params(params, num_heads)
    return seq_atten_packed(fvec_c, fvec_seq, weights, meta, b_tile=b_tile)


def init_params(key, C, out_channels, num_heads, hidden=256):
    """PyTorch-layout parameters (fp32)."""
    ks = jax.random.split(key, 8)
    return dict(
        in_proj_weight=0.02 * jax.random.normal(ks[0], (3 * C, C), jnp.float32),
        in_proj_bias=0.02 * jax.random.normal(ks[1], (3 * C,), jnp.float32),
        out_proj_w=0.02 * jax.random.normal(ks[2], (C, C), jnp.float32),
        out_proj_b=0.02 * jax.random.normal(ks[3], (C,), jnp.float32),
        ln1_g=jnp.ones((C,), jnp.float32), ln1_b=jnp.zeros((C,), jnp.float32),
        w1=0.02 * jax.random.normal(ks[4], (hidden, C), jnp.float32),
        b1=0.02 * jax.random.normal(ks[5], (hidden,), jnp.float32),
        ln2_g=jnp.ones((hidden,), jnp.float32), ln2_b=jnp.zeros((hidden,), jnp.float32),
        w2=0.02 * jax.random.normal(ks[6], (out_channels, hidden), jnp.float32),
        b2=0.02 * jax.random.normal(ks[7], (out_channels,), jnp.float32),
    )


def reference(fvec_c, fvec_seq, params, num_heads):
    """Pure-JAX fp32 mirror of the PyTorch forward (dis_enc=None path, eval dropout)."""
    B, _, C = fvec_c.shape
    L = fvec_seq.shape[1]
    head_dim = C // num_heads
    scaling = float(head_dim) ** (-0.5)
    ipw, ipb = params["in_proj_weight"], params["in_proj_bias"]

    q = fvec_c @ ipw[0:C].T + ipb[0:C]
    k = fvec_seq @ ipw[C:2 * C].T + ipb[C:2 * C]
    v = fvec_seq @ ipw[2 * C:3 * C].T + ipb[2 * C:3 * C]
    q = q * scaling

    qh = q.reshape(B, 1, num_heads, head_dim)
    kh = k.reshape(B, L, num_heads, head_dim)
    vh = v.reshape(B, L, num_heads, head_dim)
    attn = jnp.einsum('bnec,bmec->benm', qh, kh)        # (B, H, 1, L)
    attn = jax.nn.softmax(attn, axis=-1)
    vh_p = jnp.transpose(vh, (0, 2, 1, 3))              # (B, H, L, hd)
    vo = jnp.matmul(attn, vh_p)                         # (B, H, 1, hd)
    vo = jnp.transpose(vo, (0, 2, 1, 3)).reshape(B, 1, C)
    vo = vo @ params["out_proj_w"].T + params["out_proj_b"]

    def ln(x, g, b):
        mu = x.mean(-1, keepdims=True)
        var = ((x - mu) ** 2).mean(-1, keepdims=True)
        return (x - mu) / jnp.sqrt(var + 1e-5) * g + b

    h = ln(vo, params["ln1_g"], params["ln1_b"])
    h = h @ params["w1"].T + params["b1"]
    h = ln(h, params["ln2_g"], params["ln2_b"])
    return h @ params["w2"].T + params["b2"]


if __name__ == "__main__":
    B, L, C, H, OUT = 2, 8, 32, 4, 16   # batch, seq, embed_channels, n_heads, out_channels

    key = jax.random.PRNGKey(0)
    k_c, k_s, k_p = jax.random.split(key, 3)
    fvec_c = jax.random.normal(k_c, (B, 1, C), jnp.float32)
    fvec_seq = jax.random.normal(k_s, (B, L, C), jnp.float32)
    params = init_params(k_p, C, OUT, H)

    # Pack weights once (hoisted out of the hot path), then run the kernel.
    weights, meta = pack_params(params, H)
    out = seq_atten_packed(fvec_c, fvec_seq, weights, meta)
    out = jax.block_until_ready(out)

    ref = reference(fvec_c, fvec_seq, params, H)
    assert out.shape == (B, 1, OUT), out.shape
    # Tolerance accounts for bf16 MXU operands vs the fp32 reference.
    err = float(jnp.max(jnp.abs(out - ref)))
    assert jnp.allclose(out, ref, atol=2e-2, rtol=2e-2), err

    print("KERNEL_OK")
</pallas_src>

<mosaic_0001>
module attributes {stable_mosaic.version = 11 : i64} {
  func.func @_seq_atten_kernel(%arg0: i32, %arg1: memref<8x32xf32, #tpu.memory_space<vmem>>, %arg2: memref<8x8x32xf32, #tpu.memory_space<vmem>>, %arg3: memref<32x32xbf16, #tpu.memory_space<vmem>>, %arg4: memref<1x32xf32, #tpu.memory_space<vmem>>, %arg5: memref<32x32xbf16, #tpu.memory_space<vmem>>, %arg6: memref<1x32xf32, #tpu.memory_space<vmem>>, %arg7: memref<32x32xbf16, #tpu.memory_space<vmem>>, %arg8: memref<1x32xf32, #tpu.memory_space<vmem>>, %arg9: memref<32x4xbf16, #tpu.memory_space<vmem>>, %arg10: memref<4x32xbf16, #tpu.memory_space<vmem>>, %arg11: memref<32x32xbf16, #tpu.memory_space<vmem>>, %arg12: memref<1x32xf32, #tpu.memory_space<vmem>>, %arg13: memref<2x32xf32, #tpu.memory_space<vmem>>, %arg14: memref<32x256xbf16, #tpu.memory_space<vmem>>, %arg15: memref<1x256xf32, #tpu.memory_space<vmem>>, %arg16: memref<2x256xf32, #tpu.memory_space<vmem>>, %arg17: memref<256x128xbf16, #tpu.memory_space<vmem>>, %arg18: memref<1x128xf32, #tpu.memory_space<vmem>>, %arg19: memref<8x128xf32, #tpu.memory_space<vmem>>) attributes {dimension_semantics = [#tpu.dimension_semantics<parallel>], iteration_bounds = array<i64: 1>, scalar_prefetch = 0 : i64, scratch_operands = 0 : i64, tpu.core_type = #tpu.core_type<tc>, window_params = [{transform_indices = @transform_0, window_bounds = array<i64: 8, 32>}, {transform_indices = @transform_1, window_bounds = array<i64: 8, 8, 32>}, {pipeline_mode = #tpu.pipeline_mode<synchronous>, transform_indices = @transform_2, window_bounds = array<i64: 32, 32>}, {pipeline_mode = #tpu.pipeline_mode<synchronous>, transform_indices = @transform_3, window_bounds = array<i64: 1, 32>}, {pipeline_mode = #tpu.pipeline_mode<synchronous>, transform_indices = @transform_4, window_bounds = array<i64: 32, 32>}, {pipeline_mode = #tpu.pipeline_mode<synchronous>, transform_indices = @transform_5, window_bounds = array<i64: 1, 32>}, {pipeline_mode = #tpu.pipeline_mode<synchronous>, transform_indices = @transform_6, window_bounds = array<i64: 32, 32>}, {pipeline_mode = #tpu.pipeline_mode<synchronous>, transform_indices = @transform_7, window_bounds = array<i64: 1, 32>}, {pipeline_mode = #tpu.pipeline_mode<synchronous>, transform_indices = @transform_8, window_bounds = array<i64: 32, 4>}, {pipeline_mode = #tpu.pipeline_mode<synchronous>, transform_indices = @transform_9, window_bounds = array<i64: 4, 32>}, {pipeline_mode = #tpu.pipeline_mode<synchronous>, transform_indices = @transform_10, window_bounds = array<i64: 32, 32>}, {pipeline_mode = #tpu.pipeline_mode<synchronous>, transform_indices = @transform_11, window_bounds = array<i64: 1, 32>}, {pipeline_mode = #tpu.pipeline_mode<synchronous>, transform_indices = @transform_12, window_bounds = array<i64: 2, 32>}, {pipeline_mode = #tpu.pipeline_mode<synchronous>, transform_indices = @transform_13, window_bounds = array<i64: 32, 256>}, {pipeline_mode = #tpu.pipeline_mode<synchronous>, transform_indices = @transform_14, window_bounds = array<i64: 1, 256>}, {pipeline_mode = #tpu.pipeline_mode<synchronous>, transform_indices = @transform_15, window_bounds = array<i64: 2, 256>}, {pipeline_mode = #tpu.pipeline_mode<synchronous>, transform_indices = @transform_16, window_bounds = array<i64: 256, 128>}, {pipeline_mode = #tpu.pipeline_mode<synchronous>, transform_indices = @transform_17, window_bounds = array<i64: 1, 128>}, {transform_indices = @transform_18, window_bounds = array<i64: 8, 128>}]} {
    %c0 = arith.constant 0 : index
    %c0_0 = arith.constant 0 : index
    %0 = vector.load %arg1[%c0, %c0_0] : memref<8x32xf32, #tpu.memory_space<vmem>>, vector<8x32xf32>
    %c0_1 = arith.constant 0 : index
    %c0_2 = arith.constant 0 : index
    %c0_3 = arith.constant 0 : index
    %1 = vector.load %arg2[%c0_1, %c0_2, %c0_3] : memref<8x8x32xf32, #tpu.memory_space<vmem>>, vector<8x8x32xf32>
    %2 = vector.shape_cast %1 : vector<8x8x32xf32> to vector<64x32xf32>
    %3 = arith.truncf %0 : vector<8x32xf32> to vector<8x32xbf16>
    %c0_4 = arith.constant 0 : index
    %c0_5 = arith.constant 0 : index
    %4 = vector.load %arg3[%c0_4, %c0_5] : memref<32x32xbf16, #tpu.memory_space<vmem>>, vector<32x32xbf16>
    %cst = arith.constant dense<0.000000e+00> : vector<8x32xf32>
    %5 = tpu.matmul %3, %4, %cst {dimension_numbers = #tpu.dot_dimension_numbers<[1], [0], [0], [1], [0, 0, 1, 1], [], []>} : vector<8x32xbf16>, vector<32x32xbf16>, vector<8x32xf32> -> vector<8x32xf32>
    %c0_6 = arith.constant 0 : index
    %c0_7 = arith.constant 0 : index
    %6 = vector.load %arg4[%c0_6, %c0_7] : memref<1x32xf32, #tpu.memory_space<vmem>>, vector<1x32xf32>
    %7 = vector.broadcast %6 : vector<1x32xf32> to vector<8x32xf32>
    %8 = arith.addf %5, %7 : vector<8x32xf32>
    %cst_8 = arith.constant 0.353553385 : f32
    %9 = vector.broadcast %cst_8 : f32 to vector<8x32xf32>
    %10 = arith.mulf %8, %9 : vector<8x32xf32>
    %11 = arith.truncf %2 : vector<64x32xf32> to vector<64x32xbf16>
    %c0_9 = arith.constant 0 : index
    %c0_10 = arith.constant 0 : index
    %12 = vector.load %arg5[%c0_9, %c0_10] : memref<32x32xbf16, #tpu.memory_space<vmem>>, vector<32x32xbf16>
    %cst_11 = arith.constant dense<0.000000e+00> : vector<64x32xf32>
    %13 = tpu.matmul %11, %12, %cst_11 {dimension_numbers = #tpu.dot_dimension_numbers<[1], [0], [0], [1], [0, 0, 1, 1], [], []>} : vector<64x32xbf16>, vector<32x32xbf16>, vector<64x32xf32> -> vector<64x32xf32>
    %c0_12 = arith.constant 0 : index
    %c0_13 = arith.constant 0 : index
    %14 = vector.load %arg6[%c0_12, %c0_13] : memref<1x32xf32, #tpu.memory_space<vmem>>, vector<1x32xf32>
    %15 = vector.broadcast %14 : vector<1x32xf32> to vector<64x32xf32>
    %16 = arith.addf %13, %15 : vector<64x32xf32>
    %17 = arith.truncf %2 : vector<64x32xf32> to vector<64x32xbf16>
    %c0_14 = arith.constant 0 : index
    %c0_15 = arith.constant 0 : index
    %18 = vector.load %arg7[%c0_14, %c0_15] : memref<32x32xbf16, #tpu.memory_space<vmem>>, vector<32x32xbf16>
    %cst_16 = arith.constant dense<0.000000e+00> : vector<64x32xf32>
    %19 = tpu.matmul %17, %18, %cst_16 {dimension_numbers = #tpu.dot_dimension_numbers<[1], [0], [0], [1], [0, 0, 1, 1], [], []>} : vector<64x32xbf16>, vector<32x32xbf16>, vector<64x32xf32> -> vector<64x32xf32>
    %c0_17 = arith.constant 0 : index
    %c0_18 = arith.constant 0 : index
    %20 = vector.load %arg8[%c0_17, %c0_18] : memref<1x32xf32, #tpu.memory_space<vmem>>, vector<1x32xf32>
    %21 = vector.broadcast %20 : vector<1x32xf32> to vector<64x32xf32>
    %22 = arith.addf %19, %21 : vector<64x32xf32>
    %23 = vector.shape_cast %16 : vector<64x32xf32> to vector<8x8x32xf32>
    %24 = vector.shape_cast %22 : vector<64x32xf32> to vector<8x8x32xf32>
    %25 = vector.shape_cast %10 : vector<8x32xf32> to vector<8x1x32xf32>
    %26 = vector.broadcast %25 : vector<8x1x32xf32> to vector<8x8x32xf32>
    %27 = arith.mulf %26, %23 : vector<8x8x32xf32>
    %28 = vector.shape_cast %27 : vector<8x8x32xf32> to vector<64x32xf32>
    %29 = arith.truncf %28 : vector<64x32xf32> to vector<64x32xbf16>
    %c0_19 = arith.constant 0 : index
    %c0_20 = arith.constant 0 : index
    %30 = vector.load %arg9[%c0_19, %c0_20] : memref<32x4xbf16, #tpu.memory_space<vmem>>, vector<32x4xbf16>
    %cst_21 = arith.constant dense<0.000000e+00> : vector<64x4xf32>
    %31 = tpu.matmul %29, %30, %cst_21 {dimension_numbers = #tpu.dot_dimension_numbers<[1], [0], [0], [1], [0, 0, 1, 1], [], []>} : vector<64x32xbf16>, vector<32x4xbf16>, vector<64x4xf32> -> vector<64x4xf32>
    %32 = vector.shape_cast %31 : vector<64x4xf32> to vector<8x8x4xf32>
    %cst_22 = arith.constant dense<0xFF800000> : vector<8x4xf32>
    %33 = vector.multi_reduction <maximumf>, %32, %cst_22 [1] : vector<8x8x4xf32> to vector<8x4xf32>
    %34 = vector.shape_cast %33 : vector<8x4xf32> to vector<8x1x4xf32>
    %35 = vector.broadcast %34 : vector<8x1x4xf32> to vector<8x8x4xf32>
    %36 = arith.subf %32, %35 : vector<8x8x4xf32>
    %37 = math.exp %36 : vector<8x8x4xf32>
    %cst_23 = arith.constant dense<0.000000e+00> : vector<8x4xf32>
    %38 = vector.multi_reduction <add>, %37, %cst_23 [1] : vector<8x8x4xf32> to vector<8x4xf32>
    %39 = vector.shape_cast %38 : vector<8x4xf32> to vector<8x1x4xf32>
    %40 = tpu.reciprocal %39 {approx = true} : vector<8x1x4xf32> -> vector<8x1x4xf32>
    %41 = vector.broadcast %40 : vector<8x1x4xf32> to vector<8x8x4xf32>
    %42 = arith.mulf %37, %41 : vector<8x8x4xf32>
    %43 = vector.shape_cast %42 : vector<8x8x4xf32> to vector<64x4xf32>
    %44 = arith.truncf %43 : vector<64x4xf32> to vector<64x4xbf16>
    %c0_24 = arith.constant 0 : index
    %c0_25 = arith.constant 0 : index
    %45 = vector.load %arg10[%c0_24, %c0_25] : memref<4x32xbf16, #tpu.memory_space<vmem>>, vector<4x32xbf16>
    %cst_26 = arith.constant dense<0.000000e+00> : vector<64x32xf32>
    %46 = tpu.matmul %44, %45, %cst_26 {dimension_numbers = #tpu.dot_dimension_numbers<[1], [0], [0], [1], [0, 0, 1, 1], [], []>} : vector<64x4xbf16>, vector<4x32xbf16>, vector<64x32xf32> -> vector<64x32xf32>
    %47 = vector.shape_cast %46 : vector<64x32xf32> to vector<8x8x32xf32>
    %48 = arith.mulf %47, %24 : vector<8x8x32xf32>
    %cst_27 = arith.constant dense<0.000000e+00> : vector<8x32xf32>
    %49 = vector.multi_reduction <add>, %48, %cst_27 [1] : vector<8x8x32xf32> to vector<8x32xf32>
    %50 = arith.truncf %49 : vector<8x32xf32> to vector<8x32xbf16>
    %c0_28 = arith.constant 0 : index
    %c0_29 = arith.constant 0 : index
    %51 = vector.load %arg11[%c0_28, %c0_29] : memref<32x32xbf16, #tpu.memory_space<vmem>>, vector<32x32xbf16>
    %cst_30 = arith.constant dense<0.000000e+00> : vector<8x32xf32>
    %52 = tpu.matmul %50, %51, %cst_30 {dimension_numbers = #tpu.dot_dimension_numbers<[1], [0], [0], [1], [0, 0, 1, 1], [], []>} : vector<8x32xbf16>, vector<32x32xbf16>, vector<8x32xf32> -> vector<8x32xf32>
    %c0_31 = arith.constant 0 : index
    %c0_32 = arith.constant 0 : index
    %53 = vector.load %arg12[%c0_31, %c0_32] : memref<1x32xf32, #tpu.memory_space<vmem>>, vector<1x32xf32>
    %54 = vector.broadcast %53 : vector<1x32xf32> to vector<8x32xf32>
    %55 = arith.addf %52, %54 : vector<8x32xf32>
    %cst_33 = arith.constant dense<0.000000e+00> : vector<8xf32>
    %56 = vector.multi_reduction <add>, %55, %cst_33 [1] : vector<8x32xf32> to vector<8xf32>
    %57 = vector.shape_cast %56 : vector<8xf32> to vector<8x1xf32>
    %cst_34 = arith.constant 3.200000e+01 : f32
    %58 = vector.broadcast %cst_34 : f32 to vector<8x1xf32>
    %59 = arith.divf %57, %58 : vector<8x1xf32>
    %60 = vector.broadcast %59 : vector<8x1xf32> to vector<8x32xf32>
    %61 = arith.subf %55, %60 : vector<8x32xf32>
    %62 = arith.mulf %61, %61 : vector<8x32xf32>
    %cst_35 = arith.constant dense<0.000000e+00> : vector<8xf32>
    %63 = vector.multi_reduction <add>, %62, %cst_35 [1] : vector<8x32xf32> to vector<8xf32>
    %64 = vector.shape_cast %63 : vector<8xf32> to vector<8x1xf32>
    %cst_36 = arith.constant 3.200000e+01 : f32
    %65 = vector.broadcast %cst_36 : f32 to vector<8x1xf32>
    %66 = arith.divf %64, %65 : vector<8x1xf32>
    %67 = vector.broadcast %59 : vector<8x1xf32> to vector<8x32xf32>
    %68 = arith.subf %55, %67 : vector<8x32xf32>
    %cst_37 = arith.constant 9.99999974E-6 : f32
    %69 = vector.broadcast %cst_37 : f32 to vector<8x1xf32>
    %70 = arith.addf %66, %69 : vector<8x1xf32>
    %71 = math.rsqrt %70 : vector<8x1xf32>
    %72 = vector.broadcast %71 : vector<8x1xf32> to vector<8x32xf32>
    %73 = arith.mulf %68, %72 : vector<8x32xf32>
    %c0_38 = arith.constant 0 : index
    %c0_39 = arith.constant 0 : index
    %74 = vector.load %arg13[%c0_38, %c0_39] : memref<2x32xf32, #tpu.memory_space<vmem>>, vector<1x32xf32>
    %75 = vector.broadcast %74 : vector<1x32xf32> to vector<8x32xf32>
    %76 = arith.mulf %73, %75 : vector<8x32xf32>
    %c1 = arith.constant 1 : index
    %c0_40 = arith.constant 0 : index
    %77 = vector.load %arg13[%c1, %c0_40] : memref<2x32xf32, #tpu.memory_space<vmem>>, vector<1x32xf32>
    %78 = vector.broadcast %77 : vector<1x32xf32> to vector<8x32xf32>
    %79 = arith.addf %76, %78 : vector<8x32xf32>
    %80 = arith.truncf %79 : vector<8x32xf32> to vector<8x32xbf16>
    %c0_41 = arith.constant 0 : index
    %c0_42 = arith.constant 0 : index
    %81 = vector.load %arg14[%c0_41, %c0_42] : memref<32x256xbf16, #tpu.memory_space<vmem>>, vector<32x256xbf16>
    %cst_43 = arith.constant dense<0.000000e+00> : vector<8x256xf32>
    %82 = tpu.matmul %80, %81, %cst_43 {dimension_numbers = #tpu.dot_dimension_numbers<[1], [0], [0], [1], [0, 0, 1, 1], [], []>} : vector<8x32xbf16>, vector<32x256xbf16>, vector<8x256xf32> -> vector<8x256xf32>
    %c0_44 = arith.constant 0 : index
    %c0_45 = arith.constant 0 : index
    %83 = vector.load %arg15[%c0_44, %c0_45] : memref<1x256xf32, #tpu.memory_space<vmem>>, vector<1x256xf32>
    %84 = vector.broadcast %83 : vector<1x256xf32> to vector<8x256xf32>
    %85 = arith.addf %82, %84 : vector<8x256xf32>
    %cst_46 = arith.constant dense<0.000000e+00> : vector<8xf32>
    %86 = vector.multi_reduction <add>, %85, %cst_46 [1] : vector<8x256xf32> to vector<8xf32>
    %87 = vector.shape_cast %86 : vector<8xf32> to vector<8x1xf32>
    %cst_47 = arith.constant 2.560000e+02 : f32
    %88 = vector.broadcast %cst_47 : f32 to vector<8x1xf32>
    %89 = arith.divf %87, %88 : vector<8x1xf32>
    %90 = vector.broadcast %89 : vector<8x1xf32> to vector<8x256xf32>
    %91 = arith.subf %85, %90 : vector<8x256xf32>
    %92 = arith.mulf %91, %91 : vector<8x256xf32>
    %cst_48 = arith.constant dense<0.000000e+00> : vector<8xf32>
    %93 = vector.multi_reduction <add>, %92, %cst_48 [1] : vector<8x256xf32> to vector<8xf32>
    %94 = vector.shape_cast %93 : vector<8xf32> to vector<8x1xf32>
    %cst_49 = arith.constant 2.560000e+02 : f32
    %95 = vector.broadcast %cst_49 : f32 to vector<8x1xf32>
    %96 = arith.divf %94, %95 : vector<8x1xf32>
    %97 = vector.broadcast %89 : vector<8x1xf32> to vector<8x256xf32>
    %98 = arith.subf %85, %97 : vector<8x256xf32>
    %cst_50 = arith.constant 9.99999974E-6 : f32
    %99 = vector.broadcast %cst_50 : f32 to vector<8x1xf32>
    %100 = arith.addf %96, %99 : vector<8x1xf32>
    %101 = math.rsqrt %100 : vector<8x1xf32>
    %102 = vector.broadcast %101 : vector<8x1xf32> to vector<8x256xf32>
    %103 = arith.mulf %98, %102 : vector<8x256xf32>
    %c0_51 = arith.constant 0 : index
    %c0_52 = arith.constant 0 : index
    %104 = vector.load %arg16[%c0_51, %c0_52] : memref<2x256xf32, #tpu.memory_space<vmem>>, vector<1x256xf32>
    %105 = vector.broadcast %104 : vector<1x256xf32> to vector<8x256xf32>
    %106 = arith.mulf %103, %105 : vector<8x256xf32>
    %c1_53 = arith.constant 1 : index
    %c0_54 = arith.constant 0 : index
    %107 = vector.load %arg16[%c1_53, %c0_54] : memref<2x256xf32, #tpu.memory_space<vmem>>, vector<1x256xf32>
    %108 = vector.broadcast %107 : vector<1x256xf32> to vector<8x256xf32>
    %109 = arith.addf %106, %108 : vector<8x256xf32>
    %110 = arith.truncf %109 : vector<8x256xf32> to vector<8x256xbf16>
    %c0_55 = arith.constant 0 : index
    %c0_56 = arith.constant 0 : index
    %111 = vector.load %arg17[%c0_55, %c0_56] : memref<256x128xbf16, #tpu.memory_space<vmem>>, vector<256x128xbf16>
    %cst_57 = arith.constant dense<0.000000e+00> : vector<8x128xf32>
    %112 = tpu.matmul %110, %111, %cst_57 {dimension_numbers = #tpu.dot_dimension_numbers<[1], [0], [0], [1], [0, 0, 1, 1], [], []>} : vector<8x256xbf16>, vector<256x128xbf16>, vector<8x128xf32> -> vector<8x128xf32>
    %c0_58 = arith.constant 0 : index
    %c0_59 = arith.constant 0 : index
    %113 = vector.load %arg18[%c0_58, %c0_59] : memref<1x128xf32, #tpu.memory_space<vmem>>, vector<1x128xf32>
    %114 = vector.broadcast %113 : vector<1x128xf32> to vector<8x128xf32>
    %115 = arith.addf %112, %114 : vector<8x128xf32>
    %c0_60 = arith.constant 0 : index
    %c0_61 = arith.constant 0 : index
    %116 = vector.load %arg19[%c0_60, %c0_61] : memref<8x128xf32, #tpu.memory_space<vmem>>, vector<8x128xf32>
    tpu.vector_store %arg19[%c0_60, %c0_61], %115 {strides = array<i32>} : memref<8x128xf32, #tpu.memory_space<vmem>>, vector<8x128xf32>,
    return
  }
  func.func @transform_0(%arg0: i32) -> (i32, i32) {
    %c0_i32 = arith.constant 0 : i32
    %c0_i32_0 = arith.constant 0 : i32
    return %arg0, %c0_i32 : i32, i32
  }
  func.func @transform_1(%arg0: i32) -> (i32, i32, i32) {
    %c0_i32 = arith.constant 0 : i32
    %c0_i32_0 = arith.constant 0 : i32
    %c0_i32_1 = arith.constant 0 : i32
    return %arg0, %c0_i32, %c0_i32_0 : i32, i32, i32
  }
  func.func @transform_2(%arg0: i32) -> (i32, i32) {
    %c0_i32 = arith.constant 0 : i32
    %c0_i32_0 = arith.constant 0 : i32
    %c0_i32_1 = arith.constant 0 : i32
    return %c0_i32, %c0_i32_0 : i32, i32
  }
  func.func @transform_3(%arg0: i32) -> (i32, i32) {
    %c0_i32 = arith.constant 0 : i32
    %c0_i32_0 = arith.constant 0 : i32
    %c0_i32_1 = arith.constant 0 : i32
    return %c0_i32, %c0_i32_0 : i32, i32
  }
  func.func @transform_4(%arg0: i32) -> (i32, i32) {
    %c0_i32 = arith.constant 0 : i32
    %c0_i32_0 = arith.constant 0 : i32
    %c0_i32_1 = arith.constant 0 : i32
    return %c0_i32, %c0_i32_0 : i32, i32
  }
  func.func @transform_5(%arg0: i32) -> (i32, i32) {
    %c0_i32 = arith.constant 0 : i32
    %c0_i32_0 = arith.constant 0 : i32
    %c0_i32_1 = arith.constant 0 : i32
    return %c0_i32, %c0_i32_0 : i32, i32
  }
  func.func @transform_6(%arg0: i32) -> (i32, i32) {
    %c0_i32 = arith.constant 0 : i32
    %c0_i32_0 = arith.constant 0 : i32
    %c0_i32_1 = arith.constant 0 : i32
    return %c0_i32, %c0_i32_0 : i32, i32
  }
  func.func @transform_7(%arg0: i32) -> (i32, i32) {
    %c0_i32 = arith.constant 0 : i32
    %c0_i32_0 = arith.constant 0 : i32
    %c0_i32_1 = arith.constant 0 : i32
    return %c0_i32, %c0_i32_0 : i32, i32
  }
  func.func @transform_8(%arg0: i32) -> (i32, i32) {
    %c0_i32 = arith.constant 0 : i32
    %c0_i32_0 = arith.constant 0 : i32
    %c0_i32_1 = arith.constant 0 : i32
    return %c0_i32, %c0_i32_0 : i32, i32
  }
  func.func @transform_9(%arg0: i32) -> (i32, i32) {
    %c0_i32 = arith.constant 0 : i32
    %c0_i32_0 = arith.constant 0 : i32
    %c0_i32_1 = arith.constant 0 : i32
    return %c0_i32, %c0_i32_0 : i32, i32
  }
  func.func @transform_10(%arg0: i32) -> (i32, i32) {
    %c0_i32 = arith.constant 0 : i32
    %c0_i32_0 = arith.constant 0 : i32
    %c0_i32_1 = arith.constant 0 : i32
    return %c0_i32, %c0_i32_0 : i32, i32
  }
  func.func @transform_11(%arg0: i32) -> (i32, i32) {
    %c0_i32 = arith.constant 0 : i32
    %c0_i32_0 = arith.constant 0 : i32
    %c0_i32_1 = arith.constant 0 : i32
    return %c0_i32, %c0_i32_0 : i32, i32
  }
  func.func @transform_12(%arg0: i32) -> (i32, i32) {
    %c0_i32 = arith.constant 0 : i32
    %c0_i32_0 = arith.constant 0 : i32
    %c0_i32_1 = arith.constant 0 : i32
    return %c0_i32, %c0_i32_0 : i32, i32
  }
  func.func @transform_13(%arg0: i32) -> (i32, i32) {
    %c0_i32 = arith.constant 0 : i32
    %c0_i32_0 = arith.constant 0 : i32
    %c0_i32_1 = arith.constant 0 : i32
    return %c0_i32, %c0_i32_0 : i32, i32
  }
  func.func @transform_14(%arg0: i32) -> (i32, i32) {
    %c0_i32 = arith.constant 0 : i32
    %c0_i32_0 = arith.constant 0 : i32
    %c0_i32_1 = arith.constant 0 : i32
    return %c0_i32, %c0_i32_0 : i32, i32
  }
  func.func @transform_15(%arg0: i32) -> (i32, i32) {
    %c0_i32 = arith.constant 0 : i32
    %c0_i32_0 = arith.constant 0 : i32
    %c0_i32_1 = arith.constant 0 : i32
    return %c0_i32, %c0_i32_0 : i32, i32
  }
  func.func @transform_16(%arg0: i32) -> (i32, i32) {
    %c0_i32 = arith.constant 0 : i32
    %c0_i32_0 = arith.constant 0 : i32
    %c0_i32_1 = arith.constant 0 : i32
    return %c0_i32, %c0_i32_0 : i32, i32
  }
  func.func @transform_17(%arg0: i32) -> (i32, i32) {
    %c0_i32 = arith.constant 0 : i32
    %c0_i32_0 = arith.constant 0 : i32
    %c0_i32_1 = arith.constant 0 : i32
    return %c0_i32, %c0_i32_0 : i32, i32
  }
  func.func @transform_18(%arg0: i32) -> (i32, i32) {
    %c0_i32 = arith.constant 0 : i32
    %c0_i32_0 = arith.constant 0 : i32
    return %arg0, %c0_i32 : i32, i32
  }
}

</mosaic_0001>

<bundles_post_ra>
// kernel: tpu_custom_call.1
= control target key start
LH: loop header
LB: loop body
LE: loop exit
PB: predicated region body
PF: predicated region fallthrough
CT: control target
= control target key end

     0   :  { %s2290_s0 = inlined_call_operand.vmem [shape: f32[8,32], index: 0, kind: input, shape index: {}]   ;;  %s2291_s1 = inlined_call_operand.hbm [shape: f32[8,8,32], index: 1, kind: input, shape index: {}]   ;;  %s2292_s2 = inlined_call_operand.vmem [shape: bf16[32,32], index: 2, kind: input, shape index: {}]   ;;  %s2293_s3 = inlined_call_operand.vmem [shape: f32[1,32], index: 3, kind: input, shape index: {}]   ;;  %s2294_s4 = inlined_call_operand.hbm [shape: bf16[32,32], index: 4, kind: input, shape index: {}]   ;;  %s2295_s5 = inlined_call_operand.hbm [shape: f32[1,32], index: 5, kind: input, shape index: {}]   ;;  %s2296_s6 = inlined_call_operand.hbm [shape: bf16[32,32], index: 6, kind: input, shape index: {}]   ;;  %s2297_s7 = inlined_call_operand.hbm [shape: f32[1,32], index: 7, kind: input, shape index: {}]   ;;  %s2298_s8 = inlined_call_operand.vmem [shape: bf16[32,4], index: 8, kind: input, shape index: {}]   ;;  %s2299_s9 = inlined_call_operand.vmem [shape: bf16[4,32], index: 9, kind: input, shape index: {}]   ;;  %s2300_s10 = inlined_call_operand.hbm [shape: bf16[32,32], index: 10, kind: input, shape index: {}]   ;;  %s2301_s11 = inlined_call_operand.hbm [shape: f32[1,32], index: 11, kind: input, shape index: {}]   ;;  %s2302_s12 = inlined_call_operand.hbm [shape: f32[2,32], index: 12, kind: input, shape index: {}]   ;;  %s2303_s13 = inlined_call_operand.vmem [shape: bf16[32,256], index: 13, kind: input, shape index: {}]   ;;  %s2304_s14 = inlined_call_operand.vmem [shape: f32[1,256], index: 14, kind: input, shape index: {}]   ;;  %s2305_s15 = inlined_call_operand.vmem [shape: f32[2,256], index: 15, kind: input, shape index: {}]   ;;  %s2306_s16 = inlined_call_operand.hbm [shape: bf16[256,128], index: 16, kind: input, shape index: {}]   ;;  %s2307_s17 = inlined_call_operand.vmem [shape: f32[1,128], index: 17, kind: input, shape index: {}]   ;;  %s2308_s18 = inlined_call_operand.hbm [shape: f32[8,128], index: 18, kind: output, shape index: {}]  }
   0x1   :  { %2312 = sst [smem:[#allocation24_spill]] %s2290_s0 }
   0x2   :  { %2313 = sst [smem:[#allocation25_spill]] %s2291_s1 }
   0x3   :  { %2314 = sst [smem:[#allocation26_spill]] %s2292_s2 }
   0x4   :  { %2315 = sst [smem:[#allocation27_spill]] %s2308_s18 }
   0x5   :  { %23 = vsyncpa [#allocation3], 0 }
   0x6   :  { %24 = vsyncpa [#allocation6], 0 }
   0x7   :  { %25 = vsyncpa [#allocation9], 0 }
   0x8   :  { %26 = vsyncpa [#allocation12], 0 }
   0x9   :  { %27 = vsyncpa [#allocation15], 0 }
   0xa   :  { %28 = vsyncpa [#allocation4], 0  ;;  %s1887_s27 = smov [#allocation5]   ;;  %s1655_s0 = scalar_lea.hbm %s2294_s4, 256 }
   0xb   :  { %s52_s28 = sshll.u32 %s1887_s27, 4  ;;  %p1656_p0 = scmp.ne.s32.totalorder %s2294_s4, %s1655_s0  ;;  %s53_s28 = int_to_ptr.vmem [resolvable:$true] %s52_s28 }
   0xc   :  { %p1659_p1 = scmp.lt.u32.totalorder %s1655_s0, %s2294_s4 }
   0xe   :  { %p1661_p2 = pnand %p1659_p1, %p1656_p0 }
  0x10   :  { %1664 = shalt.err (!%p1661_p2)
}
  0x11   :  { %s1665_s22 = scalar_lea.vmem %s53_s28, 256  ;;  %p1670_p4 = scmp.lt.s32.totalorder %s53_s28, %s53_s28 }
  0x12   :  { %p1666_p3 = scmp.ne.s32.totalorder %s53_s28, %s1665_s22  ;;  %p1671_p5 = scmp.lt.s32.totalorder %s1665_s22, %s1665_s22 }
  0x14   :  { %p1672_p6 = por %p1671_p5, %p1670_p4 }
  0x16   :  { %p1673_p7 = pnand %p1672_p6, %p1666_p3 }
  0x18   :  { %1676 = shalt.err (!%p1673_p7)
}
  0x19   :  { %s1888_s2 = smov 64   ;;  %s1889_s23 = smov 4  }
  0x1a   :  { %58 = dma.hbm_to_vmem [thread:$0]  %s2294_s4, 256, %s53_s28, [#allocation6], %s1888_s2, %s1888_s2, %s1889_s23  }
  0x1b   :  { %s1890_s26 = smov [#allocation8]   ;;  %s1891_s29 = smov [#allocation11]  }
  0x1c   :  { %s74_s27 = sshll.u32 %s1890_s26, 4  ;;  %s100_s30 = sshll.u32 %s1891_s29, 4  ;;  %s75_s27 = int_to_ptr.vmem [resolvable:$true] %s74_s27  ;;  %s101_s30 = int_to_ptr.vmem [resolvable:$true] %s100_s30 }
  0x1d   :  { %s1677_s1 = scalar_lea.hbm %s2296_s6, 256 }
  0x1e   :  { %p1678_p8 = scmp.ne.s32.totalorder %s2296_s6, %s1677_s1  ;;  %p1681_p9 = scmp.lt.u32.totalorder %s1677_s1, %s2296_s6 }
  0x20   :  { %p1683_p10 = pnand %p1681_p9, %p1678_p8 }
  0x22   :  { %1686 = shalt.err (!%p1683_p10)
}
  0x23   :  { %s1687_s4 = scalar_lea.vmem %s75_s27, 256  ;;  %p1692_p12 = scmp.lt.s32.totalorder %s75_s27, %s75_s27 }
  0x24   :  { %p1688_p11 = scmp.ne.s32.totalorder %s75_s27, %s1687_s4  ;;  %p1693_p13 = scmp.lt.s32.totalorder %s1687_s4, %s1687_s4 }
  0x26   :  { %p1694_p0 = por %p1693_p13, %p1692_p12 }
  0x28   :  { %p1695_p1 = pnand %p1694_p0, %p1688_p11 }
  0x2a   :  { %1698 = shalt.err (!%p1695_p1)
}
  0x2b   :  { %80 = dma.hbm_to_vmem [thread:$0]  %s2296_s6, 256, %s75_s27, [#allocation9], %s1888_s2, %s1888_s2, %s1889_s23  }
  0x2c   :  { %s1699_s26 = scalar_lea.hbm %s2300_s10, 256 }
  0x2d   :  { %p1700_p2 = scmp.ne.s32.totalorder %s2300_s10, %s1699_s26  ;;  %p1703_p3 = scmp.lt.u32.totalorder %s1699_s26, %s2300_s10 }
  0x2f   :  { %p1705_p4 = pnand %p1703_p3, %p1700_p2 }
  0x31   :  { %1708 = shalt.err (!%p1705_p4)
}
  0x32   :  { %s1709_s20 = scalar_lea.vmem %s101_s30, 256  ;;  %p1714_p6 = scmp.lt.s32.totalorder %s101_s30, %s101_s30 }
  0x33   :  { %p1710_p5 = scmp.ne.s32.totalorder %s101_s30, %s1709_s20  ;;  %p1715_p7 = scmp.lt.s32.totalorder %s1709_s20, %s1709_s20 }
  0x35   :  { %p1716_p8 = por %p1715_p7, %p1714_p6 }
  0x37   :  { %p1717_p9 = pnand %p1716_p8, %p1710_p5 }
  0x39   :  { %1720 = shalt.err (!%p1717_p9)
}
  0x3a   :  { %106 = dma.hbm_to_vmem [thread:$0]  %s2300_s10, 256, %s101_s30, [#allocation12], %s1888_s2, %s1888_s2, %s1889_s23  }
  0x3b   :  { %s1892_s21 = smov [#allocation14]   ;;  %s1893_s4 = smov [#allocation2]  }
  0x3c   :  { %s123_s22 = sshll.u32 %s1892_s21, 4  ;;  %s36_s28 = sshll.u32 %s1893_s4, 4  ;;  %s124_s22 = int_to_ptr.vmem [resolvable:$true] %s123_s22  ;;  %s37_s28 = int_to_ptr.vmem [resolvable:$true] %s36_s28 }
  0x3d   :  { %s1721_s18 = scalar_lea.hbm %s2302_s12, 32 }
  0x3e   :  { %p1722_p10 = scmp.ne.s32.totalorder %s2302_s12, %s1721_s18  ;;  %p1725_p11 = scmp.lt.u32.totalorder %s1721_s18, %s2302_s12 }
  0x40   :  { %p1727_p12 = pnand %p1725_p11, %p1722_p10 }
  0x42   :  { %1730 = shalt.err (!%p1727_p12)
}
  0x43   :  { %s1731_s10 = scalar_lea.vmem %s124_s22, 32  ;;  %p1736_p0 = scmp.lt.s32.totalorder %s124_s22, %s124_s22 }
  0x44   :  { %p1732_p13 = scmp.ne.s32.totalorder %s124_s22, %s1731_s10  ;;  %p1737_p1 = scmp.lt.s32.totalorder %s1731_s10, %s1731_s10 }
  0x46   :  { %p1738_p2 = por %p1737_p1, %p1736_p0 }
  0x48   :  { %p1739_p3 = pnand %p1738_p2, %p1732_p13 }
  0x4a   :  { %1742 = shalt.err (!%p1739_p3)
}
  0x4b   :  { %126 = dma.hbm_to_vmem [thread:$0]  %s2302_s12, 32, %s124_s22, [#allocation15]  }
  0x4c   :  { %s2316_s27 = sld [smem:[#allocation25_spill]] }
  0x52   :  { %s1743_s21 = scalar_lea.hbm %s2316_s27, 1024 }
  0x53   :  { %p1744_p4 = scmp.ne.s32.totalorder %s2316_s27, %s1743_s21  ;;  %p1747_p5 = scmp.lt.u32.totalorder %s1743_s21, %s2316_s27 }
  0x55   :  { %p1749_p6 = pnand %p1747_p5, %p1744_p4 }
  0x57   :  { %1752 = shalt.err (!%p1749_p6)
}
  0x58   :  { %s1753_s26 = scalar_lea.vmem %s37_s28, 1024  ;;  %p1758_p8 = scmp.lt.s32.totalorder %s37_s28, %s37_s28 }
  0x59   :  { %p1754_p7 = scmp.ne.s32.totalorder %s37_s28, %s1753_s26  ;;  %p1759_p9 = scmp.lt.s32.totalorder %s1753_s26, %s1753_s26 }
  0x5b   :  { %p1760_p10 = por %p1759_p9, %p1758_p8 }
  0x5d   :  { %p1761_p11 = pnand %p1760_p10, %p1754_p7 }
  0x5f   :  { %1764 = shalt.err (!%p1761_p11)
}
  0x60   :  { %s1894_s12 = smov 128   ;;  %s1895_s22 = smov 8  }
  0x61   :  { %42 = dma.hbm_to_vmem [thread:$0]  %s2316_s27, 1024, %s37_s28, [#allocation3], %s1894_s12, %s1894_s12, %s1895_s22  }
  0x62   :  { %s1896_s19 = smov [#allocation7]   ;;  %s1897_s30 = smov [#allocation10]  }
  0x63   :  { %s65_s10 = sshll.u32 %s1896_s19, 4  ;;  %s87_s1 = sshll.u32 %s1897_s30, 4  ;;  %s66_s10 = int_to_ptr.vmem [resolvable:$true] %s65_s10  ;;  %s88_s1 = int_to_ptr.vmem [resolvable:$true] %s87_s1 }
  0x64   :  { %s1765_s21 = scalar_lea.hbm %s2295_s5, 16 }
  0x65   :  { %p1766_p12 = scmp.ne.s32.totalorder %s2295_s5, %s1765_s21  ;;  %p1769_p13 = scmp.lt.u32.totalorder %s1765_s21, %s2295_s5 }
  0x67   :  { %p1771_p0 = pnand %p1769_p13, %p1766_p12 }
  0x69   :  { %1774 = shalt.err (!%p1771_p0)
}
  0x6a   :  { %s1775_s28 = scalar_lea.vmem %s66_s10, 16  ;;  %s1779_s27 = scalar_lea.vmem %s66_s10, 32 }
  0x6b   :  { %p1776_p1 = scmp.ne.s32.totalorder %s66_s10, %s1775_s28  ;;  %p1780_p2 = scmp.lt.s32.totalorder %s66_s10, %s66_s10 }
  0x6c   :  { %p1781_p3 = scmp.lt.s32.totalorder %s1779_s27, %s1775_s28 }
  0x6e   :  { %p1782_p4 = por %p1781_p3, %p1780_p2 }
  0x70   :  { %p1783_p5 = pnand %p1782_p4, %p1776_p1 }
  0x72   :  { %1786 = shalt.err (!%p1783_p5)
}
  0x73   :  { %68 = dma.hbm_to_vmem [thread:$0]  %s2295_s5, 16, %s66_s10, [#allocation6]  }
  0x74   :  { %s1787_s0 = scalar_lea.hbm %s2297_s7, 16 }
  0x75   :  { %p1788_p6 = scmp.ne.s32.totalorder %s2297_s7, %s1787_s0  ;;  %p1791_p7 = scmp.lt.u32.totalorder %s1787_s0, %s2297_s7 }
  0x77   :  { %p1793_p8 = pnand %p1791_p7, %p1788_p6 }
  0x79   :  { %1796 = shalt.err (!%p1793_p8)
}
  0x7a   :  { %s1797_s21 = scalar_lea.vmem %s88_s1, 16  ;;  %s1801_s4 = scalar_lea.vmem %s88_s1, 32 }
  0x7b   :  { %p1798_p9 = scmp.ne.s32.totalorder %s88_s1, %s1797_s21  ;;  %p1802_p10 = scmp.lt.s32.totalorder %s88_s1, %s88_s1 }
  0x7c   :  { %p1803_p11 = scmp.lt.s32.totalorder %s1801_s4, %s1797_s21 }
  0x7e   :  { %p1804_p12 = por %p1803_p11, %p1802_p10 }
  0x80   :  { %p1805_p13 = pnand %p1804_p12, %p1798_p9 }
  0x82   :  { %1808 = shalt.err (!%p1805_p13)
}
  0x83   :  { %90 = dma.hbm_to_vmem [thread:$0]  %s2297_s7, 16, %s88_s1, [#allocation9]  }
  0x84   :  { %s1898_s24 = smov [#allocation13]   ;;  %s1899_s18 = smov [#allocation16]  }
  0x85   :  { %s113_s25 = sshll.u32 %s1898_s24, 4  ;;  %s138_s28 = sshll.u32 %s1899_s18, 4  ;;  %s114_s25 = int_to_ptr.vmem [resolvable:$true] %s113_s25  ;;  %s139_s28 = int_to_ptr.vmem [resolvable:$true] %s138_s28 }
  0x86   :  { %s1809_s12 = scalar_lea.hbm %s2301_s11, 16 }
  0x87   :  { %p1810_p0 = scmp.ne.s32.totalorder %s2301_s11, %s1809_s12  ;;  %p1813_p1 = scmp.lt.u32.totalorder %s1809_s12, %s2301_s11 }
  0x89   :  { %p1815_p2 = pnand %p1813_p1, %p1810_p0 }
  0x8b   :  { %1818 = shalt.err (!%p1815_p2)
}
  0x8c   :  { %s1819_s7 = scalar_lea.vmem %s114_s25, 16  ;;  %s1823_s1 = scalar_lea.vmem %s114_s25, 32 }
  0x8d   :  { %p1820_p3 = scmp.ne.s32.totalorder %s114_s25, %s1819_s7  ;;  %p1824_p4 = scmp.lt.s32.totalorder %s114_s25, %s114_s25 }
  0x8e   :  { %p1825_p5 = scmp.lt.s32.totalorder %s1823_s1, %s1819_s7 }
  0x90   :  { %p1826_p6 = por %p1825_p5, %p1824_p4 }
  0x92   :  { %p1827_p7 = pnand %p1826_p6, %p1820_p3 }
  0x94   :  { %1830 = shalt.err (!%p1827_p7)
}
  0x95   :  { %116 = dma.hbm_to_vmem [thread:$0]  %s2301_s11, 16, %s114_s25, [#allocation12]  }
  0x96   :  { %s1831_s4 = scalar_lea.hbm %s2306_s16, 2048 }
  0x97   :  { %p1832_p8 = scmp.ne.s32.totalorder %s2306_s16, %s1831_s4  ;;  %p1835_p9 = scmp.lt.u32.totalorder %s1831_s4, %s2306_s16 }
  0x99   :  { %p1837_p10 = pnand %p1835_p9, %p1832_p8 }
  0x9b   :  { %1840 = shalt.err (!%p1837_p10)
}
  0x9c   :  { %s1841_s27 = scalar_lea.vmem %s139_s28, 2048  ;;  %p1846_p12 = scmp.lt.s32.totalorder %s139_s28, %s139_s28 }
  0x9d   :  { %p1842_p11 = scmp.ne.s32.totalorder %s139_s28, %s1841_s27  ;;  %p1847_p13 = scmp.lt.s32.totalorder %s1841_s27, %s1841_s27 }
  0x9f   :  { %p1848_p0 = por %p1847_p13, %p1846_p12 }
  0xa1   :  { %p1849_p1 = pnand %p1848_p0, %p1842_p11 }
  0xa3   :  { %1852 = shalt.err (!%p1849_p1)
}
  0xa4   :  { %144 = dma.hbm_to_vmem [thread:$0]  %s2306_s16, 2048, %s139_s28, [#allocation15], %s1888_s2, %s1888_s2, %s1889_s23  }
  0xa5   :  { %1875 = dma.done.wait [#allocation3], 1024  }
  0xa6   :  { %1876 = vsyncadd [#allocation3], 4294966272 }
  0xa7   :  { %1877 = dma.done.wait [#allocation6], 272  }
  0xa8   :  { %1878 = vsyncadd [#allocation6], 4294967024 }
  0xa9   :  { %1879 = dma.done.wait [#allocation9], 272  }
  0xaa   :  { %1880 = vsyncadd [#allocation9], 4294967024 }
  0xab   :  { %1881 = dma.done.wait [#allocation12], 272  }
  0xac   :  { %1882 = vsyncadd [#allocation12], 4294967024 }
  0xad   :  { %1883 = dma.done.wait [#allocation15], 2080  }
  0xae   :  { %1884 = vsyncadd [#allocation15], 4294965216  ;;  %v1900_v0 = vmov 0.0   ;;  %vm1901_vm0 = vmmov 0   ;;  %s2317_s16 = sld [smem:[#allocation26_spill]]  ;;  %v1588_v2 = vld [vmem:[#allocation5] sm:$0xff]   ;;  %v450_v23 = vlaneseq }
  0xaf   :  { %1506 = vmatprep.subr.bf16.mxu0 %v1900_v0  ;;  %1510 = vmatprep.mubr.msk.bf16.mxu0 %vm1901_vm0, %v1900_v0  ;;  %v1590_v4 = vld [vmem:[#allocation5 + $0x8] sm:$0xff]   ;;  %s2318_s29 = sld [smem:[#allocation24_spill]]  ;;  %vm208_vm1 = vcmask 261120   ;;  %v176_v6 = vld [vmem:[#allocation2] sm:$0xff]  ;;  %v178_v10 = vld [vmem:[#allocation2 + $0x10] sm:$0xff]  ;;  %vm810_vm2 = vcmask 1041408  }
  0xb0   :  { %1514 = vmatprep.subr.bf16.mxu1 %v1588_v2  ;;  %v177_v7 = vld [vmem:[#allocation2 + $0x8] sm:$0xff]  ;;  %v179_v11 = vld [vmem:[#allocation2 + $0x18] sm:$0xff]  ;;  %v180_v12 = vld [vmem:[#allocation2 + $0x20] sm:$0xff]  ;;  %v1902_v21 = vmov 1966171168   ;;  %v2154_v25 = vshrl.u32 %v450_v23, 7 }
  0xb1   :  { %1515 = vmatpush3.bf16.msra.mxu1 %v1588_v2  ;;  %v253_v9 = vpack.c.bf16 %v177_v7, %v176_v6  ;;  %v181_v13 = vld [vmem:[#allocation2 + $0x28] sm:$0xff]  ;;  %v2134_v14 = vpack.c.bf16 %v179_v11, %v178_v10  ;;  %v182_v16 = vld [vmem:[#allocation2 + $0x30] sm:$0xff]  ;;  %v183_v17 = vld [vmem:[#allocation2 + $0x38] sm:$0xff]  ;;  %v448_v22 = vunpack.c.l.s4 %v1902_v21  ;;  %vm640_vm3 = vcmask 31744  }
  0xb2   :  { %1516 = vmatprep.subr.bf16.mxu1 %v1590_v4  ;;  %v2136_v15 = vpack.c.bf16 %v181_v13, %v180_v12  ;;  %v2144_v18 = vpack.c.bf16 %v183_v17, %v182_v16  ;;  %v1591_v19 = vld [vmem:[%s2298_s8] sm:$0xff]   ;;  %v1592_v20 = vld [vmem:[%s2298_s8 + $0x8] sm:$0xff]   ;;  %v1402_v39 = vld [vmem:[#allocation7] ss:$0 sm:$0xff]  ;;  %v2161_v41 = vsub.s32 0, %v2154_v25  ;;  %vm978_vm4 = vcmask 1041409  }
  0xb3   :  { %1518 = vmatprep.mubr.msk.bf16.mxu1 %vm208_vm1, %v253_v9  ;;  %v449_v24 = vunpack.c.0.s8 %v448_v22  ;;  %v1398_v26 = vld [vmem:[%s2293_s3] ss:$0 sm:$0xff]  ;;  %vm980_vm5 = vcmask 1042434   ;;  %vm982_vm6 = vcmask 1043459   ;;  %vm984_vm7 = vcmask 1044484  }
  0xb4   :  { %v1587_v1 = vld [vmem:[%s2317_s16] sm:$0xff]   ;;  %v1589_v3 = vld [vmem:[%s2317_s16 + $0x8] sm:$0xff]   ;;  %vm986_vm8 = vcmask 1045509   ;;  %vm988_vm9 = vcmask 1046534   ;;  %vm990_vm10 = vcmask 1047559   ;;  %s1904_s16 = smov [#allocation17]  }
  0xb5   :  { %1507 = vmatpush3.bf16.msra.mxu0 %v1587_v1  ;;  %v175_v5 = vld [vmem:[%s2318_s29] sm:$0xff]  ;;  %1517 = vmatpush3.bf16.msra.mxu1 %v1590_v4  ;;  %v452_v29 = vsub.s32 %v449_v24, %v2154_v25  ;;  %s1385_s2 = sshll.u32 %s1904_s16, 4  ;;  %s1386_s2 = int_to_ptr.vmem [resolvable:$true] %s1385_s2 }
  0xb6   :  { %1508 = vmatprep.subr.bf16.mxu0 %v1900_v0  ;;  %v184_v8 = vpack.c.bf16 %v175_v5, %v175_v5  ;;  %1538 = vmatprep.subr.bf16.mxu1 %v1591_v19  ;;  %s1853_s23 = scalar_lea.vmem %s1386_s2, 128  ;;  %p1858_p3 = scmp.lt.s32.totalorder %s1386_s2, %s1386_s2 }
  0xb7   :  { %p1854_p2 = scmp.ne.s32.totalorder %s1386_s2, %s1853_s23  ;;  %p1859_p4 = scmp.lt.s32.totalorder %s1853_s23, %s1853_s23 }
  0xb8   :  { %1519 = vmatmul.mubr.msk.bf16.vlgmr.msra.gmra.mrb[0].mxu1 %vm208_vm1, %v2134_v14 }
  0xb9   :  { %1509 = vmatpush3.bf16.msra.mxu0 %v1589_v3  ;;  %1522 = vmatprep.mubr.msk.bf16.mxu1 %vm208_vm1, %v2136_v15  ;;  %p1860_p5 = por %p1859_p4, %p1858_p3 }
  0xba   :  { %1539 = vmatpush3.bf16.msra.mxu1 %v1591_v19 }
  0xbb   :  { %1540 = vmatprep.subr.bf16.mxu1 %v1592_v20  ;;  %p1861_p6 = pnand %p1860_p5, %p1854_p2 }
  0xbc   :  { %1511 = vmatmul.mubr.msk.bf16.vlgmr.msra.gmra.mrb[0].mxu0 %vm208_vm1, %v184_v8 }
  0xbd   :  { %1530 = vmatprep.mubr.msk.bf16.mxu0 %vm208_vm1, %v253_v9 }
  0xbe   :  { %1541 = vmatpush3.bf16.msra.mxu1 %v1592_v20 }
  0xc0   :  { %1523 = vmatmul.mubr.msk.bf16.gmra.mrb[4].mxu1 %vm208_vm1, %v2144_v18 }
 0x18b   :  { %v1520_v32 = vpop.f32.mrb[0].mxu1 }
 0x18c   :  { %v326_v35 = vpop.f32.mrb[1].mxu1  ;;  %v335_v50 = vadd.f32 %v1520_v32, %v1402_v39 }
 0x18d   :  { %v1521_v36 = vpop.f32.mrb[2].mxu1  ;;  %v327_v45 = vadd.f32 %v1402_v39, %v326_v35 }
 0x18e   :  { %v329_v40 = vpop.f32.mrb[3].mxu1  ;;  %v338_v2 = vadd.f32 %v1521_v36, %v1402_v39 }
 0x18f   :  { %v246_v27 = vpop.f32.mrb[0].mxu0  ;;  %v330_v52 = vadd.f32 %v1402_v39, %v329_v40 }
 0x190   :  { %v247_v28 = vadd.f32 %v1398_v26, %v246_v27  ;;  %v1512_v30 = vpop.f32.mrb[1].mxu0  ;;  %v1593_v26 = vld [vmem:[#allocation8] sm:$0xff]   ;;  %v1594_v27 = vld [vmem:[#allocation8 + $0x8] sm:$0xff]  }
 0x191   :  { %v249_v31 = vpop.f32.mrb[2].mxu0  ;;  %1526 = vmatprep.subr.bf16.mxu0 %v1593_v26 }
 0x192   :  { %v252_v33 = vmul.f32 0.35355338, %v247_v28  ;;  %v1513_v34 = vpop.f32.mrb[3].mxu0  ;;  %1527 = vmatpush3.bf16.msra.mxu0 %v1593_v26  ;;  %v797_v28 = vld [vmem:[%s2299_s9] sm:$0x3] }
 0x193   :  { %v1524_v53 = vpop.f32.mrb[4].mxu1  ;;  %1528 = vmatprep.subr.bf16.mxu0 %v1594_v27 }
 0x194   :  { %v446_v37 = vcombine.high %v252_v33, %v252_v33  ;;  %v453_v38 = vrot.slane %v252_v33, %v452_v29  ;;  %v351_v57 = vadd.f32 %v1524_v53, %v1402_v39  ;;  %v342_v58 = vpop.f32.mrb[5].mxu1 }
 0x195   :  { %v343_v61 = vadd.f32 %v1402_v39, %v342_v58  ;;  %v1525_v63 = vpop.f32.mrb[6].mxu1 }
 0x196   :  { %v460_v42 = vrot.slane %v446_v37, %v452_v29  ;;  %v461_v43 = vcombine.high %v453_v38, %v453_v38  ;;  %v469_v44 = vrot.slane %v453_v38, %v452_v29  ;;  %v345_v5 = vpop.f32.mrb[7].mxu1  ;;  %v354_v13 = vadd.f32 %v1525_v63, %v1402_v39  ;;  %1529 = vmatpush3.bf16.msra.mxu0 %v1594_v27 }
 0x197   :  { %v346_v9 = vadd.f32 %v1402_v39, %v345_v5  ;;  %1568 = vmatprep.subr.msk.bf16.mxu0 %vm810_vm2, %v797_v28 }
 0x198   :  { %v476_v46 = vrot.slane %v460_v42, %v452_v29  ;;  %v483_v47 = vrot.slane %v461_v43, %v452_v29  ;;  %v491_v48 = vcombine.high %v469_v44, %v469_v44  ;;  %v462_v49 = vcombine.high %v460_v42, %v460_v42 }
 0x199   :  { %v498_v51 = vrot.slane %v469_v44, %v2161_v41  ;;  %1531 = vmatmul.mubr.msk.bf16.vlgmr.msra.gmra.mrb[4].mxu0 %vm208_vm1, %v2134_v14 }
 0x19a   :  { %v506_v54 = vrot.slane %v491_v48, %v2161_v41  ;;  %v493_v55 = vcombine.high %v483_v47, %v483_v47  ;;  %v502_v56 = vrot.slane %v483_v47, %v2161_v41  ;;  %v492_v60 = vcombine.high %v476_v46, %v476_v46  ;;  %1534 = vmatprep.mubr.msk.bf16.mxu0 %vm208_vm1, %v2136_v15 }
 0x19b   :  { %v535_v59 = vmul.f32 %v498_v51, %v327_v45  ;;  %v514_v62 = vrot.slane %v476_v46, %v2161_v41  ;;  %v490_v8 = vrot.slane %v462_v49, %v452_v29  ;;  %v812_v29 = vsel %vm810_vm2, %v797_v28, 0 }
 0x19c   :  { %v537_v1 = vmul.f32 %v506_v54, %v335_v50  ;;  %v510_v3 = vrot.slane %v493_v55, %v2161_v41  ;;  %v536_v4 = vmul.f32 %v502_v56, %v330_v52  ;;  %v522_v6 = vrot.slane %v492_v60, %v2161_v41  ;;  %1551 = vmatpush3.bf16.msra.mxu0 %v812_v29 }
 0x19d   :  { %v539_v7 = vmul.f32 %v514_v62, %v343_v61  ;;  %v494_v16 = vcombine.high %v490_v8, %v490_v8  ;;  %v518_v17 = vrot.slane %v490_v8, %v2161_v41  ;;  %1560 = vmatprep.subr.bf16.mxu0 %v1900_v0 }
 0x19e   :  { %v538_v10 = vmul.f32 %v510_v3, %v338_v2  ;;  %v543_v11 = vpack.c.bf16 %v536_v4, %v535_v59  ;;  %v541_v12 = vmul.f32 %v522_v6, %v351_v57 }
 0x19f   :  { %v526_v20 = vrot.slane %v494_v16, %v2161_v41  ;;  %v540_v21 = vmul.f32 %v518_v17, %v346_v9 }
 0x1a0   :  { %v544_v19 = vpack.c.bf16 %v538_v10, %v537_v1  ;;  %1542 = vmatprep.mubr.msk.bf16.mxu1 %vm208_vm1, %v543_v11 }
 0x1a1   :  { %v542_v22 = vmul.f32 %v526_v20, %v354_v13  ;;  %v545_v23 = vpack.c.bf16 %v540_v21, %v539_v7  ;;  %1535 = vmatmul.mubr.msk.bf16.gmra.mrb[8].mxu0 %vm208_vm1, %v2144_v18 }
 0x1a2   :  { %1543 = vmatmul.mubr.msk.bf16.vlgmr.msra.gmra.mrb[8].mxu1 %vm208_vm1, %v544_v19 }
 0x1a3   :  { %v546_v24 = vpack.c.bf16 %v542_v22, %v541_v12  ;;  %1546 = vmatprep.mubr.msk.bf16.mxu1 %vm208_vm1, %v545_v23 }
 0x1aa   :  { %1547 = vmatmul.mubr.msk.bf16.gmra.mrb[12].mxu1 %vm208_vm1, %v546_v24 }
 0x275   :  { %v1544_v30 = vpop.f32.mrb[8].mxu1 }
 0x276   :  { %v655_v14 = vsel %vm640_vm3, %v1544_v30, -inf  ;;  %v609_v31 = vpop.f32.mrb[9].mxu1 }
 0x277   :  { %v656_v32 = vrot.slane %v655_v14, 4  ;;  %v641_v15 = vsel %vm640_vm3, %v609_v31, -inf  ;;  %v1545_v33 = vpop.f32.mrb[10].mxu1 }
 0x278   :  { %v642_v18 = vrot.slane %v641_v15, 4  ;;  %v662_v34 = vsel %vm640_vm3, %v1545_v33, -inf  ;;  %v612_v35 = vpop.f32.mrb[11].mxu1 }
 0x279   :  { %v657_v36 = vmax.f32 %v655_v14, %v656_v32  ;;  %v663_v37 = vrot.slane %v662_v34, 4  ;;  %v648_v38 = vsel %vm640_vm3, %v612_v35, -inf }
 0x27a   :  { %v643_v39 = vmax.f32 %v641_v15, %v642_v18  ;;  %v649_v40 = vrot.slane %v648_v38, 4 }
 0x27b   :  { %v658_v42 = vrot.slane %v657_v36, 2  ;;  %v664_v43 = vmax.f32 %v662_v34, %v663_v37 }
 0x27c   :  { %v644_v44 = vrot.slane %v643_v39, 2  ;;  %v650_v45 = vmax.f32 %v648_v38, %v649_v40 }
 0x27d   :  { %v659_v46 = vmax.f32 %v657_v36, %v658_v42  ;;  %v665_v47 = vrot.slane %v664_v43, 2  ;;  %v1548_v48 = vpop.f32.mrb[12].mxu1 }
 0x27e   :  { %v645_v49 = vmax.f32 %v643_v39, %v644_v44  ;;  %v651_v50 = vrot.slane %v650_v45, 2  ;;  %v683_v51 = vsel %vm640_vm3, %v1548_v48, -inf  ;;  %v625_v52 = vpop.f32.mrb[13].mxu1 }
 0x27f   :  { %v660_v53 = vrot.slane %v659_v46, 1  ;;  %v666_v54 = vmax.f32 %v664_v43, %v665_v47  ;;  %v684_v55 = vrot.slane %v683_v51, 4  ;;  %v669_v56 = vsel %vm640_vm3, %v625_v52, -inf  ;;  %v1549_v57 = vpop.f32.mrb[14].mxu1 }
 0x280   :  { %v646_v58 = vrot.slane %v645_v49, 1  ;;  %v652_v59 = vmax.f32 %v650_v45, %v651_v50  ;;  %v670_v60 = vrot.slane %v669_v56, 4  ;;  %v690_v61 = vsel %vm640_vm3, %v1549_v57, -inf  ;;  %v628_v62 = vpop.f32.mrb[15].mxu1 }
 0x281   :  { %v661_v63 = vmax.f32 %v659_v46, %v660_v53  ;;  %v667_v1 = vrot.slane %v666_v54, 1  ;;  %v685_v2 = vmax.f32 %v683_v51, %v684_v55  ;;  %v691_v3 = vrot.slane %v690_v61, 4 }
 0x282   :  { %v647_v4 = vmax.f32 %v645_v49, %v646_v58  ;;  %v653_v5 = vrot.slane %v652_v59, 1  ;;  %v671_v6 = vmax.f32 %v669_v56, %v670_v60  ;;  %v676_v7 = vsel %vm640_vm3, %v628_v62, -inf }
 0x283   :  { %v699_v8 = vsub.f32 %v1544_v30, %v661_v63  ;;  %v668_v9 = vmax.f32 %v666_v54, %v667_v1  ;;  %v686_v10 = vrot.slane %v685_v2, 2  ;;  %v692_v11 = vmax.f32 %v690_v61, %v691_v3 }
 0x284   :  { %v697_v12 = vsub.f32 %v609_v31, %v647_v4  ;;  %v654_v13 = vmax.f32 %v652_v59, %v653_v5  ;;  %v672_v16 = vrot.slane %v671_v6, 2  ;;  %v677_v17 = vrot.slane %v676_v7, 4 }
 0x285   :  { %v709_v19 = vmul.f32 1.442695, %v699_v8  ;;  %v700_v20 = vsub.f32 %v1545_v33, %v668_v9  ;;  %v687_v21 = vmax.f32 %v685_v2, %v686_v10  ;;  %v693_v22 = vrot.slane %v692_v11, 2 }
 0x286   :  { %v705_v23 = vmul.f32 1.442695, %v697_v12  ;;  %v698_v24 = vsub.f32 %v612_v35, %v654_v13  ;;  %v673_v26 = vmax.f32 %v671_v6, %v672_v16  ;;  %v678_v27 = vmax.f32 %v676_v7, %v677_v17 }
 0x287   :  { %1619 = vpow2.f32 %v709_v19  ;;  %v711_v28 = vmul.f32 1.442695, %v700_v20  ;;  %v688_v29 = vrot.slane %v687_v21, 1  ;;  %v694_v14 = vmax.f32 %v692_v11, %v693_v22 }
 0x288   :  { %1621 = vpow2.f32 %v705_v23  ;;  %v707_v30 = vmul.f32 1.442695, %v698_v24  ;;  %v674_v32 = vrot.slane %v673_v26, 1  ;;  %v679_v15 = vrot.slane %v678_v27, 2 }
 0x289   :  { %1623 = vpow2.f32 %v711_v28  ;;  %v689_v31 = vmax.f32 %v687_v21, %v688_v29  ;;  %v695_v18 = vrot.slane %v694_v14, 1 }
 0x28a   :  { %1625 = vpow2.f32 %v707_v30  ;;  %v675_v34 = vmax.f32 %v673_v26, %v674_v32  ;;  %v680_v33 = vmax.f32 %v678_v27, %v679_v15 }
 0x28b   :  { %v703_v36 = vsub.f32 %v1548_v48, %v689_v31  ;;  %v696_v37 = vmax.f32 %v694_v14, %v695_v18 }
 0x28c   :  { %v701_v38 = vsub.f32 %v625_v52, %v675_v34  ;;  %v681_v35 = vrot.slane %v680_v33, 1 }
 0x28d   :  { %v717_v39 = vmul.f32 1.442695, %v703_v36  ;;  %v704_v40 = vsub.f32 %v1549_v57, %v696_v37 }
 0x28e   :  { %v713_v42 = vmul.f32 1.442695, %v701_v38  ;;  %v682_v43 = vmax.f32 %v680_v33, %v681_v35 }
 0x28f   :  { %1627 = vpow2.f32 %v717_v39  ;;  %v719_v44 = vmul.f32 1.442695, %v704_v40 }
 0x290   :  { %1629 = vpow2.f32 %v713_v42  ;;  %v702_v45 = vsub.f32 %v628_v62, %v682_v43 }
 0x291   :  { %v2193_v46 = vpop.eup %1619  ;;  %1631 = vpow2.f32 %v719_v44 }
 0x292   :  { %v2195_v47 = vpop.eup %1621  ;;  %v735_v49 = vsel %vm640_vm3, %v2193_v46, 0.0  ;;  %v715_v48 = vmul.f32 1.442695, %v702_v45 }
 0x293   :  { %v2199_v50 = vpop.eup %1623  ;;  %v736_v51 = vrot.slane %v735_v49, 4  ;;  %v721_v52 = vsel %vm640_vm3, %v2195_v47, 0.0 }
 0x294   :  { %v2203_v53 = vpop.eup %1625  ;;  %v722_v54 = vrot.slane %v721_v52, 4  ;;  %v742_v55 = vsel %vm640_vm3, %v2199_v50, 0.0  ;;  %1633 = vpow2.f32 %v715_v48 }
 0x295   :  { %v737_v56 = vadd.f32 %v736_v51, %v735_v49  ;;  %v743_v57 = vrot.slane %v742_v55, 4  ;;  %v728_v58 = vsel %vm640_vm3, %v2203_v53, 0.0 }
 0x296   :  { %v723_v59 = vadd.f32 %v722_v54, %v721_v52  ;;  %v729_v60 = vrot.slane %v728_v58, 4 }
 0x297   :  { %v738_v61 = vrot.slane %v737_v56, 2  ;;  %v744_v62 = vadd.f32 %v743_v57, %v742_v55 }
 0x298   :  { %v724_v63 = vrot.slane %v723_v59, 2  ;;  %v730_v1 = vadd.f32 %v729_v60, %v728_v58 }
 0x299   :  { %v2209_v2 = vpop.eup %1627  ;;  %v739_v3 = vadd.f32 %v738_v61, %v737_v56  ;;  %v745_v4 = vrot.slane %v744_v62, 2 }
 0x29a   :  { %v2211_v5 = vpop.eup %1629  ;;  %v725_v6 = vadd.f32 %v724_v63, %v723_v59  ;;  %v731_v7 = vrot.slane %v730_v1, 2  ;;  %v763_v8 = vsel %vm640_vm3, %v2209_v2, 0.0 }
 0x29b   :  { %v1632_v9 = vpop.eup %1631  ;;  %v740_v10 = vrot.slane %v739_v3, 1  ;;  %v746_v11 = vadd.f32 %v745_v4, %v744_v62  ;;  %v764_v12 = vrot.slane %v763_v8, 4  ;;  %v749_v13 = vsel %vm640_vm3, %v2211_v5, 0.0 }
 0x29c   :  { %v726_v16 = vrot.slane %v725_v6, 1  ;;  %v732_v17 = vadd.f32 %v731_v7, %v730_v1  ;;  %v750_v19 = vrot.slane %v749_v13, 4  ;;  %v770_v20 = vsel %vm640_vm3, %v1632_v9, 0.0 }
 0x29d   :  { %v741_v21 = vadd.f32 %v740_v10, %v739_v3  ;;  %v747_v22 = vrot.slane %v746_v11, 1  ;;  %v765_v23 = vadd.f32 %v764_v12, %v763_v8  ;;  %v771_v24 = vrot.slane %v770_v20, 4 }
 0x29e   :  { %v1634_v26 = vpop.eup %1633  ;;  %v727_v27 = vadd.f32 %v726_v16, %v725_v6  ;;  %v733_v28 = vrot.slane %v732_v17, 1  ;;  %v751_v29 = vadd.f32 %v750_v19, %v749_v13  ;;  %v1595_v19 = vld [vmem:[#allocation11] sm:$0xff]  }
 0x29f   :  { %1635 = vrcp.f32 %v741_v21  ;;  %v748_v14 = vadd.f32 %v747_v22, %v746_v11  ;;  %v766_v30 = vrot.slane %v765_v23, 2  ;;  %v772_v32 = vadd.f32 %v771_v24, %v770_v20  ;;  %v1409_v20 = vld [vmem:[#allocation10] ss:$0 sm:$0xff] }
 0x2a0   :  { %1637 = vrcp.f32 %v727_v27  ;;  %v734_v15 = vadd.f32 %v733_v28, %v732_v17  ;;  %v752_v31 = vrot.slane %v751_v29, 2  ;;  %v756_v18 = vsel %vm640_vm3, %v1634_v26, 0.0 }
 0x2a1   :  { %1639 = vrcp.f32 %v748_v14  ;;  %v767_v34 = vadd.f32 %v766_v30, %v765_v23  ;;  %v773_v33 = vrot.slane %v772_v32, 2  ;;  %v757_v36 = vrot.slane %v756_v18, 4 }
 0x2a2   :  { %1641 = vrcp.f32 %v734_v15  ;;  %v753_v37 = vadd.f32 %v752_v31, %v751_v29 }
 0x2a3   :  { %v768_v38 = vrot.slane %v767_v34, 1  ;;  %v774_v35 = vadd.f32 %v773_v33, %v772_v32  ;;  %v758_v39 = vadd.f32 %v757_v36, %v756_v18 }
 0x2a4   :  { %v754_v40 = vrot.slane %v753_v37, 1 }
 0x2a5   :  { %v769_v42 = vadd.f32 %v768_v38, %v767_v34  ;;  %v775_v43 = vrot.slane %v774_v35, 1  ;;  %v759_v44 = vrot.slane %v758_v39, 2 }
 0x2a6   :  { %v755_v45 = vadd.f32 %v754_v40, %v753_v37 }
 0x2a7   :  { %1643 = vrcp.f32 %v769_v42  ;;  %v776_v49 = vadd.f32 %v775_v43, %v774_v35  ;;  %v760_v48 = vadd.f32 %v759_v44, %v758_v39 }
 0x2a9   :  { %v1636_v51 = vpop.eup %1635  ;;  %1645 = vrcp.f32 %v776_v49  ;;  %v761_v52 = vrot.slane %v760_v48, 1 }
 0x2aa   :  { %v1638_v54 = vpop.eup %1637  ;;  %1647 = vrcp.f32 %v755_v45  ;;  %v787_v58 = vmul.f32 %v1636_v51, %v2193_v46 }
 0x2ab   :  { %v1640_v55 = vpop.eup %1639  ;;  %v762_v56 = vadd.f32 %v761_v52, %v760_v48  ;;  %v785_v60 = vmul.f32 %v1638_v54, %v2195_v47 }
 0x2ac   :  { %v1642_v57 = vpop.eup %1641  ;;  %v788_v59 = vmul.f32 %v1640_v55, %v2199_v50 }
 0x2ad   :  { %1649 = vrcp.f32 %v762_v56  ;;  %v786_v61 = vmul.f32 %v1642_v57, %v2203_v53  ;;  %v1532_v53 = vpop.f32.mrb[4].mxu0 }
 0x2ae   :  { %v794_v62 = vpack.c.bf16 %v788_v59, %v787_v58  ;;  %v414_v11 = vpop.f32.mrb[5].mxu0  ;;  %v423_v21 = vadd.f32 %v1532_v53, %v1409_v20 }
 0x2af   :  { %v793_v63 = vpack.c.bf16 %v786_v61, %v785_v60  ;;  %v1533_v12 = vpop.f32.mrb[6].mxu0  ;;  %v415_v22 = vadd.f32 %v1409_v20, %v414_v11 }
 0x2b0   :  { %v417_v13 = vpop.f32.mrb[7].mxu0  ;;  %v426_v24 = vadd.f32 %v1533_v12, %v1409_v20 }
 0x2b1   :  { %v1644_v1 = vpop.eup %1643  ;;  %1552 = vmatprep.mubr.msk.bf16.mxu0 %vm640_vm3, %v793_v63  ;;  %v418_v28 = vadd.f32 %v1409_v20, %v417_v13 }
 0x2b2   :  { %1553 = vmatmul.mubr.msk.bf16.vlgmr.msra.gmra.mrb[12].mxu0 %vm640_vm3, %v794_v62  ;;  %v791_v4 = vmul.f32 %v1644_v1, %v2209_v2  ;;  %v1536_v2 = vpop.f32.mrb[8].mxu0 }
 0x2b3   :  { %v1646_v3 = vpop.eup %1645  ;;  %1561 = vmatpush3.bf16.msra.mxu0 %v1595_v19  ;;  %v439_v45 = vadd.f32 %v1536_v2, %v1409_v20 }
 0x2b4   :  { %v792_v6 = vmul.f32 %v1646_v3, %v1632_v9  ;;  %v1648_v7 = vpop.eup %1647  ;;  %v430_v9 = vpop.f32.mrb[9].mxu0  ;;  %1562 = vmatprep.subr.bf16.mxu0 %v1900_v0 }
 0x2b5   :  { %v789_v50 = vmul.f32 %v1648_v7, %v2211_v5  ;;  %v1537_v16 = vpop.f32.mrb[10].mxu0  ;;  %v1596_v5 = vld [vmem:[#allocation11 + $0x8] sm:$0xff]   ;;  %v431_v51 = vadd.f32 %v1409_v20, %v430_v9 }
 0x2b6   :  { %v796_v46 = vpack.c.bf16 %v792_v6, %v791_v4  ;;  %v433_v17 = vpop.f32.mrb[11].mxu0  ;;  %v442_v56 = vadd.f32 %v1537_v16, %v1409_v20 }
 0x2b7   :  { %v1650_v8 = vpop.eup %1649  ;;  %1563 = vmatpush3.bf16.msra.mxu0 %v1596_v5  ;;  %v434_v53 = vadd.f32 %v1409_v20, %v433_v17 }
 0x2b8   :  { %v790_v10 = vmul.f32 %v1650_v8, %v1634_v26 }
 0x2ba   :  { %v795_v47 = vpack.c.bf16 %v790_v10, %v789_v50 }
 0x2bc   :  { %1556 = vmatprep.mubr.msk.bf16.mxu0 %vm640_vm3, %v795_v47 }
 0x2bd   :  { %1557 = vmatmul.mubr.msk.bf16.gmra.mrb[16].mxu0 %vm640_vm3, %v796_v46 }
 0x2be   :  { %1564 = vmatprep.mubr.msk.bf16.mxu0 %vm1901_vm0, %v1900_v0 }
 0x385   :  { %v1554_v23 = vpop.f32.mrb[12].mxu0 }
 0x386   :  { %v881_v26 = vmul.f32 %v1554_v23, %v423_v21  ;;  %v848_v27 = vpop.f32.mrb[13].mxu0 }
 0x387   :  { %v879_v29 = vmul.f32 %v848_v27, %v415_v22  ;;  %v1555_v14 = vpop.f32.mrb[14].mxu0 }
 0x388   :  { %v901_v30 = vsel %vm208_vm1, %v881_v26, 0.0  ;;  %v882_v32 = vmul.f32 %v1555_v14, %v426_v24  ;;  %v851_v15 = vpop.f32.mrb[15].mxu0 }
 0x389   :  { %v902_v31 = vrot.slane %v901_v30, 4  ;;  %v887_v18 = vsel %vm208_vm1, %v879_v29, 0.0  ;;  %v880_v0 = vmul.f32 %v851_v15, %v418_v28 }
 0x38a   :  { %v888_v34 = vrot.slane %v887_v18, 4  ;;  %v908_v33 = vsel %vm208_vm1, %v882_v32, 0.0 }
 0x38b   :  { %v903_v36 = vadd.f32 %v902_v31, %v901_v30  ;;  %v909_v37 = vrot.slane %v908_v33, 4  ;;  %v894_v38 = vsel %vm208_vm1, %v880_v0, 0.0 }
 0x38c   :  { %v889_v35 = vadd.f32 %v888_v34, %v887_v18  ;;  %v895_v39 = vrot.slane %v894_v38, 4 }
 0x38d   :  { %v904_v40 = vrot.slane %v903_v36, 2  ;;  %v910_v42 = vadd.f32 %v909_v37, %v908_v33 }
 0x38e   :  { %v890_v43 = vrot.slane %v889_v35, 2  ;;  %v896_v44 = vadd.f32 %v895_v39, %v894_v38 }
 0x38f   :  { %v905_v49 = vadd.f32 %v904_v40, %v903_v36  ;;  %v911_v48 = vrot.slane %v910_v42, 2 }
 0x390   :  { %v891_v52 = vadd.f32 %v890_v43, %v889_v35  ;;  %v897_v54 = vrot.slane %v896_v44, 2  ;;  %v1558_v55 = vpop.f32.mrb[16].mxu0 }
 0x391   :  { %v906_v57 = vrot.slane %v905_v49, 1  ;;  %v912_v58 = vadd.f32 %v911_v48, %v910_v42  ;;  %v885_v59 = vmul.f32 %v1558_v55, %v439_v45  ;;  %v864_v60 = vpop.f32.mrb[17].mxu0 }
 0x392   :  { %v892_v61 = vrot.slane %v891_v52, 1  ;;  %v898_v62 = vadd.f32 %v897_v54, %v896_v44  ;;  %v883_v63 = vmul.f32 %v864_v60, %v431_v51  ;;  %v1559_v1 = vpop.f32.mrb[18].mxu0 }
 0x393   :  { %v907_v3 = vadd.f32 %v906_v57, %v905_v49  ;;  %v913_v4 = vrot.slane %v912_v58, 1  ;;  %v929_v6 = vsel %vm208_vm1, %v885_v59, 0.0  ;;  %v886_v7 = vmul.f32 %v1559_v1, %v442_v56  ;;  %v867_v46 = vpop.f32.mrb[19].mxu0 }
 0x394   :  { %v893_v8 = vadd.f32 %v892_v61, %v891_v52  ;;  %v899_v50 = vrot.slane %v898_v62, 1  ;;  %v930_v10 = vrot.slane %v929_v6, 4  ;;  %v915_v47 = vsel %vm208_vm1, %v883_v63, 0.0 }
 0x395   :  { %v914_v11 = vadd.f32 %v913_v4, %v912_v58  ;;  %v916_v12 = vrot.slane %v915_v47, 4  ;;  %v936_v13 = vsel %vm208_vm1, %v886_v7, 0.0  ;;  %v945_v5 = vpack.c.bf16 %v907_v3, %v907_v3  ;;  %v1426_v3 = vld [vmem:[#allocation13] ss:$0 sm:$0xff] }
 0x396   :  { %v943_v2 = vpack.c.bf16 %v893_v8, %v893_v8  ;;  %v900_v9 = vadd.f32 %v899_v50, %v898_v62  ;;  %v931_v16 = vadd.f32 %v930_v10, %v929_v6  ;;  %v937_v19 = vrot.slane %v936_v13, 4 }
 0x397   :  { %v917_v21 = vadd.f32 %v916_v12, %v915_v47  ;;  %v884_v22 = vmul.f32 %v867_v46, %v434_v53  ;;  %v946_v23 = vpack.c.bf16 %v914_v11, %v914_v11  ;;  %v972_v15 = vunpack.c.l.b16 %v945_v5 }
 0x398   :  { %v944_v24 = vpack.c.bf16 %v900_v9, %v900_v9  ;;  %v932_v26 = vrot.slane %v931_v16, 2  ;;  %v938_v27 = vadd.f32 %v937_v19, %v936_v13  ;;  %v970_v28 = vunpack.c.l.b16 %v943_v2  ;;  %v1599_v13 = vld [vmem:[%s2303_s13 + $0x4] ss:$8 sps:$4 sm:$0xff]   ;;  %v1597_v2 = vld [vmem:[%s2303_s13] ss:$8 sps:$4 sm:$0xff]  }
 0x399   :  { %v918_v29 = vrot.slane %v917_v21, 2  ;;  %v922_v17 = vsel %vm208_vm1, %v884_v22, 0.0  ;;  %v973_v18 = vunpack.c.l.b16 %v946_v23  ;;  %1114 = vmatprep.subr.bf16.mxu0 %v1599_v13  ;;  %v1600_v9 = vld [vmem:[%s2303_s13 + $0x10] ss:$8 sps:$4 sm:$0xff]   ;;  %v1903_v19 = vmov 0  }
 0x39a   :  { %v971_v20 = vunpack.c.l.b16 %v944_v24  ;;  %v933_v14 = vadd.f32 %v932_v26, %v931_v16  ;;  %v939_v30 = vrot.slane %v938_v27, 2  ;;  %v923_v32 = vrot.slane %v922_v17, 4  ;;  %v1602_v16 = vld [vmem:[%s2303_s13 + $0x14] ss:$8 sps:$4 sm:$0xff]  }
 0x39b   :  { %v919_v31 = vadd.f32 %v918_v29, %v917_v21  ;;  %v1430_v24 = vld [vmem:[#allocation14] ss:$0 sm:$0xff] }
 0x39c   :  { %v979_v0 = vsel %vm978_vm4, %v971_v20, %v970_v28  ;;  %v940_v34 = vadd.f32 %v939_v30, %v938_v27  ;;  %v924_v33 = vadd.f32 %v923_v32, %v922_v17  ;;  %v934_v37 = vrot.slane %v933_v14, 1  ;;  %v1431_v27 = vld [vmem:[#allocation14 + $0x1] ss:$0 sm:$0xff]  ;;  %v1079_v20 = vld [vmem:[%s2304_s14] sm:$0x3] }
 0x39d   :  { %v981_v36 = vsel %vm980_vm5, %v972_v15, %v979_v0  ;;  %v920_v38 = vrot.slane %v919_v31, 1  ;;  %v1084_v30 = vrot.slane %v1079_v20, %v2161_v41 }
 0x39e   :  { %v983_v35 = vsel %vm982_vm6, %v973_v18, %v981_v36  ;;  %v941_v39 = vrot.slane %v940_v34, 1  ;;  %v925_v40 = vrot.slane %v924_v33, 2  ;;  %v935_v44 = vadd.f32 %v934_v37, %v933_v14  ;;  %v1603_v37 = vld [vmem:[#allocation16 + $0x40] sm:$0xff]  }
 0x39f   :  { %v921_v42 = vadd.f32 %v920_v38, %v919_v31  ;;  %v2261_v14 = vsub.s32 1, %v2154_v25  ;;  %v1604_v38 = vld [vmem:[#allocation16] sm:$0xff]   ;;  %1484 = vmatprep.subr.bf16.mxu1 %v1603_v37 }
 0x3a0   :  { %v926_v43 = vadd.f32 %v925_v40, %v924_v33  ;;  %v942_v49 = vadd.f32 %v941_v39, %v940_v34  ;;  %v949_v54 = vpack.c.bf16 %v935_v44, %v935_v44  ;;  %1485 = vmatpush3.bf16.msra.mxu1 %v1604_v38  ;;  %v1606_v39 = vld [vmem:[#allocation16 + $0x8] sm:$0xff]  }
 0x3a1   :  { %v947_v45 = vpack.c.bf16 %v921_v42, %v921_v42  ;;  %v1088_v32 = vrot.slane %v1079_v20, %v2261_v14 }
 0x3a2   :  { %v927_v48 = vrot.slane %v926_v43, 1  ;;  %v950_v56 = vpack.c.bf16 %v942_v49, %v942_v49  ;;  %v976_v59 = vunpack.c.l.b16 %v949_v54  ;;  %v1610_v54 = vld [vmem:[#allocation16 + $0x18] sm:$0xff]  }
 0x3a3   :  { %v974_v51 = vunpack.c.l.b16 %v947_v45 }
 0x3a4   :  { %v928_v52 = vadd.f32 %v927_v48, %v926_v43  ;;  %v977_v60 = vunpack.c.l.b16 %v950_v56  ;;  %v1607_v48 = vld [vmem:[#allocation16 + $0x50] sm:$0xff]   ;;  %v1612_v56 = vld [vmem:[#allocation16 + $0x20] sm:$0xff]  }
 0x3a5   :  { %v985_v55 = vsel %vm984_vm7, %v974_v51, %v983_v35  ;;  %v1605_v35 = vld [vmem:[#allocation16 + $0x48] sm:$0xff]   ;;  %v1608_v51 = vld [vmem:[#allocation16 + $0x10] sm:$0xff]  }
 0x3a6   :  { %v948_v57 = vpack.c.bf16 %v928_v52, %v928_v52  ;;  %1486 = vmatprep.subr.bf16.mxu1 %v1605_v35  ;;  %v1609_v52 = vld [vmem:[#allocation16 + $0x58] sm:$0xff]  }
 0x3a7   :  { %1487 = vmatpush3.bf16.msra.mxu1 %v1606_v39 }
 0x3a8   :  { %v975_v58 = vunpack.c.l.b16 %v948_v57  ;;  %1488 = vmatprep.subr.bf16.mxu1 %v1607_v48  ;;  %v1613_v57 = vld [vmem:[#allocation16 + $0x68] sm:$0xff]  }
 0x3aa   :  { %v987_v61 = vsel %vm986_vm8, %v975_v58, %v985_v55  ;;  %v1611_v55 = vld [vmem:[#allocation16 + $0x60] sm:$0xff]   ;;  %v1614_v58 = vld [vmem:[#allocation16 + $0x28] sm:$0xff]  }
 0x3ab   :  { %v989_v62 = vsel %vm988_vm9, %v976_v59, %v987_v61  ;;  %1489 = vmatpush3.bf16.msra.mxu1 %v1608_v51  ;;  %v1615_v59 = vld [vmem:[#allocation16 + $0x70] sm:$0xff]   ;;  %v1617_v61 = vld [vmem:[#allocation16 + $0x78] sm:$0xff]  }
 0x3ac   :  { %v991_v63 = vsel %vm990_vm10, %v977_v60, %v989_v62  ;;  %1490 = vmatprep.subr.bf16.mxu1 %v1609_v52  ;;  %v1616_v60 = vld [vmem:[#allocation16 + $0x30] sm:$0xff]   ;;  %v1618_v62 = vld [vmem:[#allocation16 + $0x38] sm:$0xff]  }
 0x3ad   :  { %v992_v1 = vpack.c.b16 %v991_v63, %v991_v63 }
 0x3af   :  { %1565 = vmatmul.mubr.msk.bf16.vlgmr.msra.gmra.mrb[20].mxu0 %vm208_vm1, %v992_v1  ;;  %1491 = vmatpush3.bf16.msra.mxu1 %v1610_v54 }
 0x3b0   :  { %1115 = vmatpush1.bf16.msra.mxu0 %v1597_v2  ;;  %1146 = vmatprep.mubr.bf16.mxu0 %v1903_v19 }
 0x3b1   :  { %1116 = vmatprep.subr.bf16.mxu0 %v1602_v16  ;;  %1492 = vmatprep.subr.bf16.mxu1 %v1611_v55 }
 0x3b3   :  { %1493 = vmatpush3.bf16.msra.mxu1 %v1612_v56 }
 0x3b4   :  { %1117 = vmatpush1.bf16.msra.mxu0 %v1600_v9  ;;  %1494 = vmatprep.subr.bf16.mxu1 %v1613_v57 }
 0x3b7   :  { %1495 = vmatpush3.bf16.msra.mxu1 %v1614_v58 }
 0x3b8   :  { %1496 = vmatprep.subr.bf16.mxu1 %v1615_v59 }
 0x3bb   :  { %1497 = vmatpush3.bf16.msra.mxu1 %v1616_v60 }
 0x3bc   :  { %1498 = vmatprep.subr.bf16.mxu1 %v1617_v61 }
 0x3bf   :  { %1499 = vmatpush3.bf16.msra.mxu1 %v1618_v62 }
 0x482   :  { %v1042_v4 = vpop.f32.mrb[20].mxu0 }
 0x483   :  { %v1043_v6 = vadd.f32 %v1426_v3, %v1042_v4  ;;  %v1566_v7 = vpop.f32.mrb[21].mxu0  ;;  %v1172_v4 = vld [vmem:[%s2305_s15] ss:$2 sm:$0x3] }
 0x484   :  { %v1045_v46 = vpop.f32.mrb[22].mxu0  ;;  %v1177_v7 = vrot.slane %v1172_v4, %v2161_v41 }
 0x485   :  { %v1567_v8 = vpop.f32.mrb[23].mxu0  ;;  %v1048_v50 = vsel %vm208_vm1, %v1043_v6, 0.0  ;;  %v1181_v46 = vrot.slane %v1172_v4, %v2261_v14 }
 0x486   :  { %1049 = vadd.xlane.f32.xlu0 %v1048_v50 }
 0x513   :  { %v1050_v10 = vpop.xlane.xlu0 %1049 }
 0x514   :  { %v1052_v47 = vmul.f32 0.03125, %v1050_v10 }
 0x516   :  { %v1053_v53 = vsub.f32 %v1043_v6, %v1052_v47  ;;  %v1437_v6 = vld [vmem:[%s2305_s15 + $0x1] ss:$2 sm:$0x3] }
 0x517   :  { %v1192_v47 = vrot.slane %v1437_v6, %v2161_v41 }
 0x518   :  { %v1054_v11 = vmul.f32 %v1053_v53, %v1053_v53 }
 0x51a   :  { %v1055_v12 = vsel %vm208_vm1, %v1054_v11, 0.0 }
 0x51b   :  { %1056 = vadd.xlane.f32.xlu0 %v1055_v12 }
 0x5a8   :  { %v1057_v5 = vpop.xlane.xlu0 %1056 }
 0x5a9   :  { %v1058_v21 = vmul.f32 0.03125, %v1057_v5  ;;  %v1438_v5 = vld [vmem:[%s2307_s17] ss:$0 sm:$0xff] }
 0x5ab   :  { %v1059_v22 = vadd.f32 1e-05, %v1058_v21 }
 0x5ad   :  { %1651 = vrsqrt.f32 %v1059_v22 }
 0x5b7   :  { %v1652_v23 = vpop.eup %1651 }
 0x5b8   :  { %v1061_v26 = vmul.f32 %v1652_v23, %v1053_v53  ;;  %v1196_v53 = vrot.slane %v1437_v6, %v2261_v14 }
 0x5ba   :  { %v1067_v28 = vmul.f32 %v1430_v24, %v1061_v26 }
 0x5bc   :  { %v1073_v29 = vadd.f32 %v1431_v27, %v1067_v28 }
 0x5be   :  { %v1074_v17 = vpack.c.bf16 %v1073_v29, %v1073_v29 }
 0x5c0   :  { %1436 = vmatmul.mubr.msk.bf16.vlgmr.msra.gmra.mrb[24].mxu0 %vm208_vm1, %v1074_v17 }
 0x693   :  { %v1148_v15 = vpop.f32.mrb[24].mxu0 }
 0x694   :  { %v1149_v31 = vadd.f32 %v1148_v15, %v1084_v30  ;;  %v1150_v18 = vpop.f32.mrb[25].mxu0 }
 0x695   :  { %v1151_v0 = vadd.f32 %v1150_v18, %v1088_v32  ;;  %v1152_v34 = vpop.f32.mrb[26].mxu0 }
 0x696   :  { %v1153_v33 = vpop.f32.mrb[27].mxu0 }
 0x697   :  { %v1155_v36 = vadd.f32 %v1151_v0, %v1149_v31 }
 0x699   :  { %1156 = vadd.xlane.f32.xlu1 %v1155_v36 }
 0x726   :  { %v1157_v25 = vpop.xlane.xlu1 %1156 }
 0x727   :  { %v1159_v40 = vmul.f32 0.00390625, %v1157_v25 }
 0x729   :  { %v1160_v42 = vsub.f32 %v1149_v31, %v1159_v40  ;;  %v1161_v43 = vsub.f32 %v1151_v0, %v1159_v40 }
 0x72b   :  { %v1162_v44 = vmul.f32 %v1160_v42, %v1160_v42  ;;  %v1163_v45 = vmul.f32 %v1161_v43, %v1161_v43 }
 0x72d   :  { %v1164_v49 = vadd.f32 %v1163_v45, %v1162_v44 }
 0x72f   :  { %1165 = vadd.xlane.f32.xlu1 %v1164_v49 }
 0x7bc   :  { %v1166_v63 = vpop.xlane.xlu1 %1165 }
 0x7bd   :  { %v1167_v1 = vmul.f32 0.00390625, %v1166_v63 }
 0x7bf   :  { %v1168_v3 = vadd.f32 1e-05, %v1167_v1 }
 0x7c1   :  { %1653 = vrsqrt.f32 %v1168_v3 }
 0x7cb   :  { %v1654_v8 = vpop.eup %1653 }
 0x7cc   :  { %v1170_v50 = vmul.f32 %v1654_v8, %v1160_v42  ;;  %v1171_v10 = vmul.f32 %v1654_v8, %v1161_v43 }
 0x7ce   :  { %v1184_v11 = vmul.f32 %v1177_v7, %v1170_v50  ;;  %v1185_v12 = vmul.f32 %v1181_v46, %v1171_v10 }
 0x7d0   :  { %v1199_v13 = vadd.f32 %v1192_v47, %v1184_v11  ;;  %v1200_v2 = vadd.f32 %v1196_v53, %v1185_v12 }
 0x7d2   :  { %v1201_v9 = vpack.c.bf16 %v1199_v13, %v1199_v13  ;;  %v1202_v16 = vpack.c.bf16 %v1200_v2, %v1200_v2 }
 0x7d4   :  { %1370 = vmatprep.mubr.bf16.mxu1 %v1202_v16 }
 0x7d5   :  { %1371 = vmatmul.mubr.bf16.vlgmr.msra.gmra.mrb[16].mxu1 %v1201_v9 }
 0x8a8   :  { %v1500_v19 = vpop.f32.mrb[16].mxu1 }
 0x8a9   :  { %v1501_v21 = vpop.f32.mrb[17].mxu1 }
 0x8aa   :  { %v1502_v22 = vadd.f32 %v1501_v21, %v1500_v19  ;;  %v1503_v41 = vpop.f32.mrb[18].mxu1 }
 0x8ab   :  { %v1504_v23 = vpop.f32.mrb[19].mxu1 }
 0x8ac   :  { %v1373_v24 = vadd.f32 %v1502_v22, %v1438_v5 }
 0x8ae   :  { %1378 = vst [vmem:[#allocation17] sm:$0xff] %v1373_v24 }
 0x8af   :  { %1864 = shalt.err (!%p1861_p6)
}
 0x8b0   :  { %s2319_s29 = sld [smem:[#allocation27_spill]] }
 0x8b6   :  { %s1865_s17 = scalar_lea.hbm %s2319_s29, 128 }
 0x8b7   :  { %p1866_p7 = scmp.ne.s32.totalorder %s2319_s29, %s1865_s17  ;;  %p1869_p8 = scmp.lt.u32.totalorder %s1865_s17, %s2319_s29 }
 0x8b9   :  { %p1871_p9 = pnand %p1869_p8, %p1866_p7 }
 0x8bb   :  { %1874 = shalt.err (!%p1871_p9)
}
 0x8bc   :  { %1388 = dma.vmem_to_hbm [thread:$0]  %s1386_s2, 128, %s2319_s29, [#allocation4]  }
 0x8bd   :  { %1885 = dma.done.wait [#allocation4], 128  }
 0x8be   :  { %1886 = vsyncadd [#allocation4], 4294967168 }
 0x8bf   :  { %1392 = vsyncpa [#allocation3], 1 }
 0x8c0   :  { %1393 = vsyncpa [#allocation6], 1 }
 0x8c1   :  { %1394 = vsyncpa [#allocation9], 1 }
 0x8c2   :  { %1395 = vsyncpa [#allocation12], 1 }
 0x8c3   :  { %1396 = vsyncpa [#allocation15], 1 }
 0x8c4   :  { %1397 = vsyncpa [#allocation4], 1 }

</bundles_post_ra>
